<compile_context>
chip_gen: v6e
topology: v6e:2x2x1
jax: 0.10.0
libtpu: 0.0.40
codegen_flags: <defaults>
</compile_context>

<pallas_src>
import functools

import jax
import jax.numpy as jnp
from jax import lax
from jax.experimental import pallas as pl
from jax.experimental.pallas import tpu as pltpu


def _local_grouper_kernel(xyzT_ref, rhs_ref, tri_ref, new_xyz_ref, new_pts_ref,
                          *, S, K, N, D, radius):
    f32 = jnp.float32
    hi = lax.Precision.HIGHEST
    xyzT = xyzT_ref[0]          # [3, N]
    rhs = rhs_ref[0]            # [N, D+3] = [points | xyz]
    tri = tri_ref[...]          # [N, N] bf16 (row<=col), resident across grid

    col_1n = lax.broadcasted_iota(jnp.int32, (1, N), 1)
    col_sn = lax.broadcasted_iota(jnp.int32, (S, N), 1)
    row_s1 = lax.broadcasted_iota(jnp.int32, (S, 1), 0)
    xyz_sq = jnp.sum(xyzT * xyzT, axis=0, keepdims=True)              # [1, N]

    # ---- furthest point sampling (deterministic start at index 0) ----------
    # Carry: selected index per row [S,1] i32, running min distance [1,N], and
    # the current farthest index.  O(N) work per iteration.
    def fps_body(i, carry):
        far_rows, dmin, far = carry
        far_rows = jnp.where(row_s1 == i, far, far_rows)
        onehot = (col_1n == far).astype(f32)                          # [1, N]
        centroid = jnp.sum(xyzT * onehot, axis=1, keepdims=True)      # [3, 1]
        c_sq = jnp.sum(centroid * centroid)
        c_dot = jnp.sum(xyzT * centroid, axis=0, keepdims=True)       # [1, N]
        d = xyz_sq + c_sq - 2.0 * c_dot                               # [1, N]
        dmin = jnp.minimum(dmin, d)
        mx = jnp.max(dmin)
        far = jnp.min(jnp.where(dmin == mx, col_1n, N)).astype(jnp.int32)
        return far_rows, dmin, far

    carry0 = (jnp.zeros((S, 1), jnp.int32),
              jnp.full((1, N), 1e10, f32),
              jnp.int32(0))
    far_rows, _, _ = lax.fori_loop(0, S, fps_body, carry0)
    fps_sel = (far_rows == col_sn).astype(f32)                        # [S, N]

    # One-hot gather of [anchor_points | anchor_xyz]; HIGHEST keeps it bit-exact.
    anchor_full = jnp.dot(fps_sel, rhs, precision=hi,
                          preferred_element_type=f32)                 # [S, D+3]
    anchor = anchor_full[:, :D]                                       # [S, D]
    new_xyz = anchor_full[:, D:]                                      # [S, 3]
    new_xyz_ref[0] = new_xyz

    # ---- query_ball_point: first K in-radius indices (ascending), padded with
    # the first in-radius index (torch sort-then-mask semantics) -------------
    nsq = jnp.sum(new_xyz * new_xyz, axis=-1, keepdims=True)          # [S, 1]
    sqr = nsq + xyz_sq - 2.0 * jnp.dot(new_xyz, xyzT, precision=hi,
                                       preferred_element_type=f32)    # [S, N]
    mask = sqr <= (radius * radius)                                   # [S, N]
    # rank[s,j] = #in-radius points with index <= j.  bf16 0/1 inputs with f32
    # MXU accumulation are exact; single-pass matmul.
    rank = jnp.dot(mask.astype(jnp.bfloat16), tri,
                   preferred_element_type=f32)                        # [S, N]
    cnt = jnp.sum(mask.astype(f32), axis=-1, keepdims=True)           # [S, 1]
    onehot_first = jnp.logical_and(mask, rank == 1.0).astype(f32)     # [S, N]

    # ---- fused K-slot one-hot gather: one [S*K, N] x [N, D+3] matmul --------
    kkf = (lax.broadcasted_iota(jnp.int32, (1, K, N), 1) + 1).astype(f32)
    selk = jnp.logical_and(rank[:, None, :] == kkf,
                           mask[:, None, :]).astype(f32)              # [S, K, N]
    has = cnt[:, None, :] >= kkf                                      # [S, K, N]
    oh = jnp.where(has, selk, onehot_first[:, None, :]).reshape(S * K, N)

    grouped = jnp.dot(oh, rhs, precision=hi,
                      preferred_element_type=f32)                     # [S*K, D+3]
    anchor_rep = jnp.broadcast_to(anchor[:, None, :],
                                  (S, K, D)).reshape(S * K, D)        # [S*K, D]
    new_pts_ref[0] = jnp.concatenate([grouped, anchor_rep], axis=-1)  # [S*K, F]


def local_grouper(xyz, points, *, groups, kneighbors, radius, use_xyz=True):
    assert use_xyz, "kernel built for use_xyz=True"
    B, N, _ = xyz.shape
    D = points.shape[-1]
    F = 2 * D + 3
    S, K = groups, kneighbors
    xyz = xyz.astype(jnp.float32)
    points = points.astype(jnp.float32)

    xyzT = jnp.transpose(xyz, (0, 2, 1))                              # [B, 3, N]
    rhs = jnp.concatenate([points, xyz], axis=-1)                     # [B, N, D+3]
    # Upper-triangular ones (bf16) for the cumulative-rank matmul; built once.
    tri = (jnp.arange(N)[:, None] <= jnp.arange(N)[None, :]).astype(jnp.bfloat16)

    kernel = functools.partial(_local_grouper_kernel, S=S, K=K, N=N, D=D,
                               radius=float(radius))
    new_xyz, new_pts = pl.pallas_call(
        kernel,
        out_shape=(jax.ShapeDtypeStruct((B, S, 3), jnp.float32),
                   jax.ShapeDtypeStruct((B, S * K, F), jnp.float32)),
        grid=(B,),
        in_specs=[pl.BlockSpec((1, 3, N), lambda b: (b, 0, 0)),
                  pl.BlockSpec((1, N, D + 3), lambda b: (b, 0, 0)),
                  pl.BlockSpec((N, N), lambda b: (0, 0))],
        out_specs=(pl.BlockSpec((1, S, 3), lambda b: (b, 0, 0)),
                   pl.BlockSpec((1, S * K, F), lambda b: (b, 0, 0))),
        compiler_params=pltpu.CompilerParams(
            dimension_semantics=("parallel",)),
    )(xyzT, rhs, tri)

    new_points = new_pts.reshape(B, S, K, F)                          # free reshape
    return new_xyz, new_points


# --------- pure-JAX reference (mirrors the torch forward semantics) ----------
def _ref_local_grouper(xyz, points, *, groups, kneighbors, radius):
    B, N, _ = xyz.shape
    S, K = groups, kneighbors
    hi = lax.Precision.HIGHEST

    def fps_single(x):
        xsq = jnp.sum(x * x, axis=-1)

        def body(i, carry):
            idxs, dmin, far = carry
            idxs = idxs.at[i].set(far)
            c = x[far]
            d = xsq + jnp.sum(c * c) - 2.0 * jnp.dot(x, c, precision=hi)
            dmin = jnp.minimum(dmin, d)
            far = jnp.argmax(dmin).astype(jnp.int32)
            return idxs, dmin, far

        init = (jnp.zeros((S,), jnp.int32), jnp.full((N,), 1e10, jnp.float32),
                jnp.int32(0))
        idxs, _, _ = lax.fori_loop(0, S, body, init)
        return idxs

    fps_idx = jax.vmap(fps_single)(xyz)                               # [B, S]
    b2 = jnp.arange(B)[:, None]
    new_xyz = xyz[b2, fps_idx]                                        # [B, S, 3]
    anchor = points[b2, fps_idx]                                      # [B, S, D]

    sqr = (jnp.sum(new_xyz ** 2, -1)[..., None]
           + jnp.sum(xyz ** 2, -1)[:, None, :]
           - 2.0 * jnp.matmul(new_xyz, jnp.transpose(xyz, (0, 2, 1)),
                              precision=hi))                          # [B, S, N]
    gidx = jnp.broadcast_to(jnp.arange(N)[None, None, :], (B, S, N))
    gidx = jnp.where(sqr > radius ** 2, N, gidx)
    gidx = jnp.sort(gidx, axis=-1)[:, :, :K]
    first = gidx[:, :, 0:1]
    gidx = jnp.where(gidx == N, jnp.broadcast_to(first, gidx.shape), gidx)
    b3 = jnp.arange(B)[:, None, None]
    grouped_xyz = xyz[b3, gidx]                                       # [B,S,K,3]
    grouped_points = points[b3, gidx]                                 # [B,S,K,D]
    grouped_points = jnp.concatenate([grouped_points, grouped_xyz], -1)
    new_points = jnp.concatenate(
        [grouped_points,
         jnp.broadcast_to(anchor[:, :, None, :], (B, S, K, points.shape[-1]))],
        axis=-1)
    return new_xyz, new_points


if __name__ == "__main__":
    B, N, D = 2, 64, 8           # channel = D
    groups, kneighbors, radius = 16, 8, 0.4

    key = jax.random.PRNGKey(0)
    kx, kp = jax.random.split(key)
    xyz = jax.random.uniform(kx, (B, N, 3), dtype=jnp.float32)
    points = jax.random.normal(kp, (B, N, D), dtype=jnp.float32)

    # Parameters declared in LocalGrouper.__init__ (normalize='center',
    # use_xyz=True). They are NOT used by this forward pass; kept for fidelity.
    affine_alpha = jnp.ones((1, 1, 1, D + 3), jnp.float32)
    affine_beta = jnp.zeros((1, 1, 1, D + 3), jnp.float32)

    new_xyz, new_points = local_grouper(xyz, points, groups=groups,
                                        kneighbors=kneighbors, radius=radius)
    jax.block_until_ready((new_xyz, new_points))

    ref_xyz, ref_points = _ref_local_grouper(xyz, points, groups=groups,
                                             kneighbors=kneighbors,
                                             radius=radius)
    assert new_xyz.shape == (B, groups, 3)
    assert new_points.shape == (B, groups, kneighbors, 2 * D + 3)
    assert jnp.allclose(new_xyz, ref_xyz, atol=1e-4, rtol=1e-4)
    assert jnp.allclose(new_points, ref_points, atol=1e-4, rtol=1e-4)
    print("KERNEL_OK")
</pallas_src>

<mosaic_0001>
module attributes {stable_mosaic.version = 11 : i64} {
  func.func @_local_grouper_kernel(%arg0: i32, %arg1: memref<1x3x64xf32, #tpu.memory_space<vmem>>, %arg2: memref<1x64x11xf32, #tpu.memory_space<vmem>>, %arg3: memref<64x64xbf16, #tpu.memory_space<vmem>>, %arg4: memref<1x16x3xf32, #tpu.memory_space<vmem>>, %arg5: memref<1x128x19xf32, #tpu.memory_space<vmem>>) attributes {dimension_semantics = [#tpu.dimension_semantics<parallel>], iteration_bounds = array<i64: 2>, scalar_prefetch = 0 : i64, scratch_operands = 0 : i64, tpu.core_type = #tpu.core_type<tc>, window_params = [{transform_indices = @transform_0, window_bounds = array<i64: 1, 3, 64>}, {transform_indices = @transform_1, window_bounds = array<i64: 1, 64, 11>}, {pipeline_mode = #tpu.pipeline_mode<synchronous>, transform_indices = @transform_2, window_bounds = array<i64: 64, 64>}, {transform_indices = @transform_3, window_bounds = array<i64: 1, 16, 3>}, {transform_indices = @transform_4, window_bounds = array<i64: 1, 128, 19>}]} {
    %c0 = arith.constant 0 : index
    %c0_0 = arith.constant 0 : index
    %c0_1 = arith.constant 0 : index
    %0 = vector.load %arg1[%c0, %c0_0, %c0_1] : memref<1x3x64xf32, #tpu.memory_space<vmem>>, vector<1x3x64xf32>
    %1 = vector.shape_cast %0 : vector<1x3x64xf32> to vector<3x64xf32>
    %c0_2 = arith.constant 0 : index
    %c0_3 = arith.constant 0 : index
    %c0_4 = arith.constant 0 : index
    %2 = vector.load %arg2[%c0_2, %c0_3, %c0_4] : memref<1x64x11xf32, #tpu.memory_space<vmem>>, vector<1x64x11xf32>
    %3 = vector.shape_cast %2 : vector<1x64x11xf32> to vector<64x11xf32>
    %c0_5 = arith.constant 0 : index
    %c0_6 = arith.constant 0 : index
    %4 = vector.load %arg3[%c0_5, %c0_6] : memref<64x64xbf16, #tpu.memory_space<vmem>>, vector<64x64xbf16>
    %5 = tpu.iota {dimensions = array<i32: 1>} : vector<1x64xi32>
    %6 = tpu.iota {dimensions = array<i32: 1>} : vector<16x64xi32>
    %7 = tpu.iota {dimensions = array<i32: 0>} : vector<16x1xi32>
    %8 = arith.mulf %1, %1 : vector<3x64xf32>
    %cst = arith.constant dense<0.000000e+00> : vector<64xf32>
    %9 = vector.multi_reduction <add>, %8, %cst [0] : vector<3x64xf32> to vector<64xf32>
    %10 = vector.shape_cast %9 : vector<64xf32> to vector<1x64xf32>
    %c0_i32 = arith.constant 0 : i32
    %11 = vector.broadcast %c0_i32 : i32 to vector<16x1xi32>
    %cst_7 = arith.constant 1.000000e+10 : f32
    %12 = vector.broadcast %cst_7 : f32 to vector<1x64xf32>
    %c0_i32_8 = arith.constant 0 : i32
    %c0_i32_9 = arith.constant 0 : i32
    %c16_i32 = arith.constant 16 : i32
    %13 = arith.addi %c0_i32_9, %c16_i32 : i32
    %c1_i32 = arith.constant 1 : i32
    %14:3 = scf.for %arg6 = %c0_i32_9 to %13 step %c1_i32 iter_args(%arg7 = %11, %arg8 = %12, %arg9 = %c0_i32_8) -> (vector<16x1xi32>, vector<1x64xf32>, i32)  : i32 {
      %81 = vector.broadcast %arg6 : i32 to vector<16x1xi32>
      %82 = arith.cmpi eq, %7, %81 : vector<16x1xi32>
      %83 = vector.broadcast %arg9 : i32 to vector<16x1xi32>
      %84 = arith.select %82, %83, %arg7 : vector<16x1xi1>, vector<16x1xi32>
      %85 = vector.broadcast %arg9 : i32 to vector<1x64xi32>
      %86 = arith.cmpi eq, %5, %85 : vector<1x64xi32>
      %87 = arith.extui %86 : vector<1x64xi1> to vector<1x64xi32>
      %88 = arith.sitofp %87 : vector<1x64xi32> to vector<1x64xf32>
      %89 = vector.broadcast %88 : vector<1x64xf32> to vector<3x64xf32>
      %90 = arith.mulf %1, %89 : vector<3x64xf32>
      %cst_27 = arith.constant dense<0.000000e+00> : vector<3xf32>
      %91 = vector.multi_reduction <add>, %90, %cst_27 [1] : vector<3x64xf32> to vector<3xf32>
      %92 = vector.shape_cast %91 : vector<3xf32> to vector<3x1xf32>
      %93 = arith.mulf %92, %92 : vector<3x1xf32>
      %94 = vector.shape_cast %93 : vector<3x1xf32> to vector<1x3x1xf32>
      %cst_28 = arith.constant dense<0.000000e+00> : vector<1xf32>
      %95 = vector.multi_reduction <add>, %94, %cst_28 [1, 2] : vector<1x3x1xf32> to vector<1xf32>
      %96 = vector.shape_cast %95 : vector<1xf32> to vector<1x1x1xf32>
      %97 = vector.extract %96[0, 0, 0] : f32 from vector<1x1x1xf32>
      %98 = vector.broadcast %92 : vector<3x1xf32> to vector<3x64xf32>
      %99 = arith.mulf %1, %98 : vector<3x64xf32>
      %cst_29 = arith.constant dense<0.000000e+00> : vector<64xf32>
      %100 = vector.multi_reduction <add>, %99, %cst_29 [0] : vector<3x64xf32> to vector<64xf32>
      %101 = vector.shape_cast %100 : vector<64xf32> to vector<1x64xf32>
      %102 = vector.broadcast %97 : f32 to vector<1x64xf32>
      %103 = arith.addf %10, %102 : vector<1x64xf32>
      %cst_30 = arith.constant 2.000000e+00 : f32
      %104 = vector.broadcast %cst_30 : f32 to vector<1x64xf32>
      %105 = arith.mulf %104, %101 : vector<1x64xf32>
      %106 = arith.subf %103, %105 : vector<1x64xf32>
      %107 = arith.minimumf %arg8, %106 : vector<1x64xf32>
      %108 = vector.shape_cast %107 : vector<1x64xf32> to vector<1x1x64xf32>
      %cst_31 = arith.constant dense<0xFF800000> : vector<1xf32>
      %109 = vector.multi_reduction <maximumf>, %108, %cst_31 [1, 2] : vector<1x1x64xf32> to vector<1xf32>
      %110 = vector.shape_cast %109 : vector<1xf32> to vector<1x1x1xf32>
      %111 = vector.extract %110[0, 0, 0] : f32 from vector<1x1x1xf32>
      %112 = vector.broadcast %111 : f32 to vector<1x64xf32>
      %113 = arith.cmpf oeq, %107, %112 : vector<1x64xf32>
      %c64_i32 = arith.constant 64 : i32
      %114 = vector.broadcast %c64_i32 : i32 to vector<1x64xi32>
      %115 = arith.select %113, %5, %114 : vector<1x64xi1>, vector<1x64xi32>
      %116 = vector.shape_cast %115 : vector<1x64xi32> to vector<1x1x64xi32>
      %cst_32 = arith.constant dense<2147483647> : vector<1xi32>
      %117 = vector.multi_reduction <minsi>, %116, %cst_32 [1, 2] : vector<1x1x64xi32> to vector<1xi32>
      %118 = vector.shape_cast %117 : vector<1xi32> to vector<1x1x1xi32>
      %119 = vector.extract %118[0, 0, 0] : i32 from vector<1x1x1xi32>
      scf.yield %84, %107, %119 : vector<16x1xi32>, vector<1x64xf32>, i32
    }
    %c16_i32_10 = arith.constant 16 : i32
    %15 = vector.broadcast %14#0 : vector<16x1xi32> to vector<16x64xi32>
    %16 = arith.cmpi eq, %15, %6 : vector<16x64xi32>
    %17 = arith.extui %16 : vector<16x64xi1> to vector<16x64xi32>
    %18 = arith.sitofp %17 : vector<16x64xi32> to vector<16x64xf32>
    %cst_11 = arith.constant dense<0.000000e+00> : vector<16x11xf32>
    %19 = tpu.matmul %18, %3, %cst_11 {dimension_numbers = #tpu.dot_dimension_numbers<[1], [0], [0], [1], [0, 0, 1, 1], [], []>, precision = #tpu.contract_precision<fp32>} : vector<16x64xf32>, vector<64x11xf32>, vector<16x11xf32> -> vector<16x11xf32>
    %20 = vector.extract_strided_slice %19 {offsets = [0, 0], sizes = [16, 8], strides = [1, 1]} : vector<16x11xf32> to vector<16x8xf32>
    %21 = vector.extract_strided_slice %19 {offsets = [0, 8], sizes = [16, 3], strides = [1, 1]} : vector<16x11xf32> to vector<16x3xf32>
    %c0_12 = arith.constant 0 : index
    %c0_13 = arith.constant 0 : index
    %c0_14 = arith.constant 0 : index
    %22 = vector.load %arg4[%c0_12, %c0_13, %c0_14] : memref<1x16x3xf32, #tpu.memory_space<vmem>>, vector<1x16x3xf32>
    %23 = vector.shape_cast %22 : vector<1x16x3xf32> to vector<16x3xf32>
    %24 = vector.shape_cast %21 : vector<16x3xf32> to vector<1x16x3xf32>
    tpu.vector_store %arg4[%c0_12, %c0_13, %c0_14], %24 {strides = array<i32>} : memref<1x16x3xf32, #tpu.memory_space<vmem>>, vector<1x16x3xf32>,
    %25 = arith.mulf %21, %21 : vector<16x3xf32>
    %cst_15 = arith.constant dense<0.000000e+00> : vector<16xf32>
    %26 = vector.multi_reduction <add>, %25, %cst_15 [1] : vector<16x3xf32> to vector<16xf32>
    %27 = vector.shape_cast %26 : vector<16xf32> to vector<16x1xf32>
    %28 = vector.broadcast %27 : vector<16x1xf32> to vector<16x64xf32>
    %29 = vector.broadcast %10 : vector<1x64xf32> to vector<16x64xf32>
    %30 = arith.addf %28, %29 : vector<16x64xf32>
    %cst_16 = arith.constant dense<0.000000e+00> : vector<16x64xf32>
    %31 = tpu.matmul %21, %1, %cst_16 {dimension_numbers = #tpu.dot_dimension_numbers<[1], [0], [0], [1], [0, 0, 1, 1], [], []>, precision = #tpu.contract_precision<fp32>} : vector<16x3xf32>, vector<3x64xf32>, vector<16x64xf32> -> vector<16x64xf32>
    %cst_17 = arith.constant 2.000000e+00 : f32
    %32 = vector.broadcast %cst_17 : f32 to vector<16x64xf32>
    %33 = arith.mulf %32, %31 : vector<16x64xf32>
    %34 = arith.subf %30, %33 : vector<16x64xf32>
    %cst_18 = arith.constant 1.600000e-01 : f32
    %35 = vector.broadcast %cst_18 : f32 to vector<16x64xf32>
    %36 = arith.cmpf ole, %34, %35 : vector<16x64xf32>
    %37 = arith.extui %36 : vector<16x64xi1> to vector<16x64xi32>
    %38 = arith.sitofp %37 : vector<16x64xi32> to vector<16x64xf32>
    %39 = arith.truncf %38 : vector<16x64xf32> to vector<16x64xbf16>
    %cst_19 = arith.constant dense<0.000000e+00> : vector<16x64xf32>
    %40 = tpu.matmul %39, %4, %cst_19 {dimension_numbers = #tpu.dot_dimension_numbers<[1], [0], [0], [1], [0, 0, 1, 1], [], []>} : vector<16x64xbf16>, vector<64x64xbf16>, vector<16x64xf32> -> vector<16x64xf32>
    %41 = arith.extui %36 : vector<16x64xi1> to vector<16x64xi32>
    %42 = arith.sitofp %41 : vector<16x64xi32> to vector<16x64xf32>
    %cst_20 = arith.constant dense<0.000000e+00> : vector<16xf32>
    %43 = vector.multi_reduction <add>, %42, %cst_20 [1] : vector<16x64xf32> to vector<16xf32>
    %44 = vector.shape_cast %43 : vector<16xf32> to vector<16x1xf32>
    %cst_21 = arith.constant 1.000000e+00 : f32
    %45 = vector.broadcast %cst_21 : f32 to vector<16x64xf32>
    %46 = arith.cmpf oeq, %40, %45 : vector<16x64xf32>
    %47 = arith.andi %36, %46 : vector<16x64xi1>
    %48 = arith.extui %47 : vector<16x64xi1> to vector<16x64xi32>
    %49 = arith.sitofp %48 : vector<16x64xi32> to vector<16x64xf32>
    %50 = tpu.iota {dimensions = array<i32: 1>} : vector<1x8x64xi32>
    %c1_i32_22 = arith.constant 1 : i32
    %51 = vector.broadcast %c1_i32_22 : i32 to vector<1x8x64xi32>
    %52 = arith.addi %50, %51 : vector<1x8x64xi32>
    %53 = arith.sitofp %52 : vector<1x8x64xi32> to vector<1x8x64xf32>
    %54 = vector.shape_cast %40 : vector<16x64xf32> to vector<16x1x64xf32>
    %55 = vector.broadcast %54 : vector<16x1x64xf32> to vector<16x8x64xf32>
    %56 = vector.broadcast %53 : vector<1x8x64xf32> to vector<16x8x64xf32>
    %57 = arith.cmpf oeq, %55, %56 : vector<16x8x64xf32>
    %58 = vector.shape_cast %36 : vector<16x64xi1> to vector<16x1x64xi1>
    %59 = vector.broadcast %58 : vector<16x1x64xi1> to vector<16x8x64xi1>
    %60 = arith.andi %57, %59 : vector<16x8x64xi1>
    %61 = arith.extui %60 : vector<16x8x64xi1> to vector<16x8x64xi32>
    %62 = arith.sitofp %61 : vector<16x8x64xi32> to vector<16x8x64xf32>
    %63 = vector.shape_cast %44 : vector<16x1xf32> to vector<16x1x1xf32>
    %64 = vector.broadcast %63 : vector<16x1x1xf32> to vector<16x8x64xf32>
    %65 = vector.broadcast %53 : vector<1x8x64xf32> to vector<16x8x64xf32>
    %66 = arith.cmpf oge, %64, %65 : vector<16x8x64xf32>
    %67 = vector.shape_cast %49 : vector<16x64xf32> to vector<16x1x64xf32>
    %68 = vector.shape_cast %67 : vector<16x1x64xf32> to vector<16x1x64xf32>
    %69 = vector.broadcast %68 : vector<16x1x64xf32> to vector<16x8x64xf32>
    %70 = arith.select %66, %62, %69 : vector<16x8x64xi1>, vector<16x8x64xf32>
    %71 = vector.shape_cast %70 : vector<16x8x64xf32> to vector<128x64xf32>
    %cst_23 = arith.constant dense<0.000000e+00> : vector<128x11xf32>
    %72 = tpu.matmul %71, %3, %cst_23 {dimension_numbers = #tpu.dot_dimension_numbers<[1], [0], [0], [1], [0, 0, 1, 1], [], []>, precision = #tpu.contract_precision<fp32>} : vector<128x64xf32>, vector<64x11xf32>, vector<128x11xf32> -> vector<128x11xf32>
    %73 = vector.shape_cast %20 : vector<16x8xf32> to vector<16x1x8xf32>
    %74 = vector.shape_cast %73 : vector<16x1x8xf32> to vector<16x1x8xf32>
    %75 = vector.broadcast %74 : vector<16x1x8xf32> to vector<16x8x8xf32>
    %76 = vector.shape_cast %75 : vector<16x8x8xf32> to vector<128x8xf32>
    %77 = tpu.concatenate %72, %76 in 1 : vector<128x11xf32>, vector<128x8xf32> -> vector<128x19xf32>
    %c0_24 = arith.constant 0 : index
    %c0_25 = arith.constant 0 : index
    %c0_26 = arith.constant 0 : index
    %78 = vector.load %arg5[%c0_24, %c0_25, %c0_26] : memref<1x128x19xf32, #tpu.memory_space<vmem>>, vector<1x128x19xf32>
    %79 = vector.shape_cast %78 : vector<1x128x19xf32> to vector<128x19xf32>
    %80 = vector.shape_cast %77 : vector<128x19xf32> to vector<1x128x19xf32>
    tpu.vector_store %arg5[%c0_24, %c0_25, %c0_26], %80 {strides = array<i32>} : memref<1x128x19xf32, #tpu.memory_space<vmem>>, vector<1x128x19xf32>,
    return
  }
  func.func @transform_0(%arg0: i32) -> (i32, i32, i32) {
    %c0_i32 = arith.constant 0 : i32
    %c0_i32_0 = arith.constant 0 : i32
    %c0_i32_1 = arith.constant 0 : i32
    return %arg0, %c0_i32, %c0_i32_0 : i32, i32, i32
  }
  func.func @transform_1(%arg0: i32) -> (i32, i32, i32) {
    %c0_i32 = arith.constant 0 : i32
    %c0_i32_0 = arith.constant 0 : i32
    %c0_i32_1 = arith.constant 0 : i32
    return %arg0, %c0_i32, %c0_i32_0 : i32, i32, i32
  }
  func.func @transform_2(%arg0: i32) -> (i32, i32) {
    %c0_i32 = arith.constant 0 : i32
    %c0_i32_0 = arith.constant 0 : i32
    %c0_i32_1 = arith.constant 0 : i32
    return %c0_i32, %c0_i32_0 : i32, i32
  }
  func.func @transform_3(%arg0: i32) -> (i32, i32, i32) {
    %c0_i32 = arith.constant 0 : i32
    %c0_i32_0 = arith.constant 0 : i32
    %c0_i32_1 = arith.constant 0 : i32
    return %arg0, %c0_i32, %c0_i32_0 : i32, i32, i32
  }
  func.func @transform_4(%arg0: i32) -> (i32, i32, i32) {
    %c0_i32 = arith.constant 0 : i32
    %c0_i32_0 = arith.constant 0 : i32
    %c0_i32_1 = arith.constant 0 : i32
    return %arg0, %c0_i32, %c0_i32_0 : i32, i32, i32
  }
}

</mosaic_0001>

<bundles_post_ra>
// kernel: tpu_custom_call.1
= control target key start
LH: loop header
LB: loop body
LE: loop exit
PB: predicated region body
PF: predicated region fallthrough
CT: control target
= control target key end

     0   :  { %s4716_s15 = smov 0   ;;  %s6523_s0 = inlined_call_operand.vmem [shape: f32[2,3,64], index: 0, kind: input, shape index: {}]   ;;  %s6524_s1 = inlined_call_operand.vmem [shape: f32[2,64,11], index: 1, kind: input, shape index: {}]   ;;  %s6525_s2 = inlined_call_operand.vmem [shape: bf16[64,64], index: 2, kind: input, shape index: {}]   ;;  %s6526_s3 = inlined_call_operand.vmem [shape: f32[2,16,3], index: 3, kind: output, shape index: {0}]   ;;  %s6527_s4 = inlined_call_operand.vmem [shape: f32[2,128,19], index: 4, kind: output, shape index: {1}]  }
   0x1 LB: > { %s3885_s16 = sadd.s32 4294967295, %s4662_s15   ;;  %p3889_p0 = scmp.ge.s32.totalorder %s4662_s15, 1  ;;  %s4662_s15 = sphi %s4716_s15, %s15_s15  }
   0x2   : > { %p174_p1 = scmp.lt.s32.totalorder %s4662_s15, 3 }
   0x4   : > { %p175_p2 = pnand %p3889_p0, %p174_p1 }
   0x6   : > { %178 = sbr.rel (%p175_p2) target bundleno = 1985 (0x7c1), region = 32 }
   0xb   : > { %p209_p3 = scmp.lt.s32.totalorder %s3885_s16, 1  ;;  %v4727_v0 = vld [vmem:[%s6525_s2] sm:$0xf]  ;;  %v4732_v1 = vld [vmem:[%s6525_s2 + $0x4] sm:$0xf]  ;;  %v246_v2 = vlaneseq  ;;  %vm252_vm0 = vcmask 518144  }
   0xc   : > { %v4737_v3 = vld [vmem:[%s6525_s2 + $0x8] sm:$0xf]  ;;  %v4742_v4 = vld [vmem:[%s6525_s2 + $0xc] sm:$0xf]  ;;  %v4747_v5 = vld [vmem:[%s6525_s2 + $0x10] sm:$0xf] }
   0xd   : > { %s6757_s16 = smov (!%p209_p3, %s3885_s16), 1  ;;  %v4752_v6 = vld [vmem:[%s6525_s2 + $0x14] sm:$0xf]  ;;  %v4757_v7 = vld [vmem:[%s6525_s2 + $0x18] sm:$0xf]  ;;  %v4759_v8 = vand.u32 127, %v246_v2 }
   0xe   : > { %v4764_v9 = vld [vmem:[%s6525_s2 + $0x1c] sm:$0xf]  ;;  %v4766_v10 = vshrl.u32 %v246_v2, 7  ;;  %s3890_s7 = sshll.u32 %s6757_s16, 2  ;;  %s3933_s8 = sshll.u32 %s6757_s16, 6  ;;  %v4814_v30 = vmov 0  }
   0xf   : > { %s212_s11 = scalar_lea.vmem %s6523_s0, %s3890_s7  ;;  %s217_s14 = scalar_lea.vmem %s6524_s1, %s3933_s8  ;;  %v4812_v29 = vmov 1e+10   ;;  %v4816_v31 = vmov 0  }
  0x10   : > { %v4775_v11 = vadd.s32 8, %v4766_v10  ;;  %s3934_s17 = sshll.u32 %s6757_s16, 4  ;;  %s3935_s18 = sshll.u32 %s6757_s16, 7  ;;  %v4777_v12 = vld [vmem:[%s212_s11] sm:$0x7]  ;;  %v4781_v14 = vld [vmem:[%s217_s14 + $0x8] sm:$0xff] }
  0x11   : > { %v4779_v13 = vld [vmem:[%s217_s14] sm:$0xff]  ;;  %s4786_s21 = scalar_lea.vmem %s6526_s3, %s3934_s17  ;;  %s4791_s24 = scalar_lea.vmem %s6527_s4, %s3935_s18  ;;  %v4793_v15 = vld [vmem:[%s217_s14 + $0x10] sm:$0xff]  ;;  %v4795_v16 = vld [vmem:[%s217_s14 + $0x18] sm:$0xff]  ;;  %v251_v18 = vmul.f32 %v4777_v12, %v4777_v12 }
  0x12   : > { %v4797_v17 = vld [vmem:[%s217_s14 + $0x20] sm:$0xff]  ;;  %v4801_v19 = vld [vmem:[%s217_s14 + $0x28] sm:$0xff]  ;;  %v4803_v20 = vld [vmem:[%s217_s14 + $0x30] sm:$0xff]  ;;  %s4810_s16 = smov 0   ;;  %s4818_s25 = smov 0  }
  0x13   : > { %v4805_v21 = vld [vmem:[%s217_s14 + $0x38] sm:$0xff]  ;;  %v253_v22 = vsel %vm252_vm0, %v251_v18, 0.0 }
  0x14   : > { %v254_v23 = vrot.slane %v253_v22, 4 }
  0x16   : > { %v255_v24 = vadd.f32 %v254_v23, %v253_v22 }
  0x18   : > { %v256_v25 = vrot.slane %v255_v24, 2 }
  0x1a   : > { %v257_v26 = vadd.f32 %v256_v25, %v255_v24 }
  0x1c   : > { %v258_v27 = vrot.slane %v257_v26, 1 }
  0x1e   : > { %v4808_v28 = vadd.f32 %v258_v27, %v257_v26 }
  0x1f LB: >> { %v270_v32 = vstv %s4682_s25  ;;  %v273_v33 = vstv %s4666_s16  ;;  %v4684_v34 = vmov 0.0   ;;  %vm284_vm4 = vcmask 2048   ;;  %s265_s25 = sadd.s32 1, %s4682_s25   ;;  %s4682_s25 = sphi %s4818_s25, %s265_s25   ;;  %v4678_v31 = vphi %v4816_v31, %v6577_v31   ;;  %v4674_v30 = vphi %v4814_v30, %v6576_v30   ;;  %v4670_v29 = vphi %v4812_v29, %v307_v29   ;;  %s4666_s16 = sphi %s4810_s16, %s4580_s16  }
  0x20   : >> { %vm271_vm1 = vcmp.eq.s32.totalorder %v4766_v10, %v270_v32  ;;  %vm272_vm2 = vcmp.eq.s32.totalorder %v4775_v11, %v270_v32  ;;  %vm276_vm3 = vcmp.eq.s32.totalorder %v4759_v8, %v273_v33  ;;  %vm308_vm5 = vcmask 523264   ;;  %p262_p4 = scmp.ge.s32.totalorder %s265_s25, 16  }
  0x21   : >> { %v3897_v35 = vsel %vm276_vm3, 1.0, %v4684_v34  ;;  %v4831_v31 = vsel %vm271_vm1, %v273_v33, %v4678_v31   ;;  %v4833_v30 = vsel %vm272_vm2, %v273_v33, %v4674_v30   ;;  %vm958_vm10 = vcmask (%p262_p4), 1042432   ;;  %s4686_s28 = smov (%p262_p4), 120   ;;  %s4688_s29 = smov (%p262_p4), 11  }
  0x22   : >> { %v6574_v36 = vmov %v4831_v31  ;;  %v6575_v37 = vmov %v4833_v30  ;;  %v279_v38 = vmul.f32 %v3897_v35, %v4777_v12  ;;  %vm933_vm11 = vcmask (%p262_p4), 23552  }
  0x23   : > { %vm332_vm8 = vcmp.eq.s32.totalorder (%p262_p4), %v6574_v36, %v4759_v8  ;;  %vm333_vm9 = vcmp.eq.s32.totalorder (%p262_p4), %v6575_v37, %v4759_v8  ;;  %vm4689_vm12 = vmmov (%p262_p4), 0  }
  0x24   : >> { %v280_v39 = vsel %vm252_vm0, %v279_v38, 0.0  ;;  %v4857_v38 = vand.u32 (%p262_p4), 4294901760, %v4805_v21 }
  0x25   : >> { %281 = vadd.xlane.f32.xlu0 %v280_v39  ;;  %v4860_v39 = vand.u32 (%p262_p4), 4294901760, %v4803_v20 }
  0x26   : > { %4163 = vmatprep.subr.mxu0 (%p262_p4), %v4857_v38  ;;  %v4880_v11 = vsub.f32 (%p262_p4), %v4805_v21, %v4857_v38 }
  0x27   : > { %4164 = vmatpush3.msra.mxu0 (%p262_p4), %v4857_v38 }
  0x28   : > { %4165 = vmatprep.subr.mxu0 (%p262_p4), %v4860_v39 }
  0x29   : > { %4166 = vmatpush3.msra.mxu0 (%p262_p4), %v4860_v39 }
  0xae   : >> { %v282_v40 = vpop.xlane.xlu0 %281 }
  0xaf   : >> { %v283_v41 = vmul.f32 %v282_v40, %v282_v40  ;;  %v295_v50 = vmul.f32 %v282_v40, %v4777_v12  ;;  %v4863_v40 = vand.u32 (%p262_p4), 4294901760, %v4801_v19 }
  0xb1   : >> { %v285_v42 = vsel %vm284_vm4, %v283_v41, 0.0  ;;  %v296_v51 = vsel %vm252_vm0, %v295_v50, 0.0  ;;  %v4866_v41 = vand.u32 (%p262_p4), 4294901760, %v4797_v17  ;;  %4167 = vmatprep.subr.mxu0 (%p262_p4), %v4863_v40 }
  0xb2   : >> { %286 = vadd.xlane.f32.xlu0 %v285_v42  ;;  %v297_v52 = vrot.slane %v296_v51, 4  ;;  %v4869_v42 = vand.u32 (%p262_p4), 4294901760, %v4795_v16  ;;  %4168 = vmatpush3.msra.mxu0 (%p262_p4), %v4863_v40 }
  0xb3   : > { %4169 = vmatprep.subr.mxu0 (%p262_p4), %v4866_v41 }
  0xb4   : >> { %v298_v53 = vadd.f32 %v297_v52, %v296_v51  ;;  %6578 = vst [vmem:[#allocation2_spill] sm:$0xff] (%p262_p4), %v4869_v42  ;;  %v4899_v21 = vsub.f32 (%p262_p4), %v4795_v16, %v4869_v42  ;;  %v4918_v16 = vand.u32 (%p262_p4), 4294901760, %v4779_v13  ;;  %4170 = vmatpush3.msra.mxu0 (%p262_p4), %v4866_v41 }
  0xb5   : > { %4171 = vmatprep.subr.mxu0 (%p262_p4), %v4869_v42 }
  0xb6   : >> { %v299_v54 = vrot.slane %v298_v53, 2  ;;  %6584 = vst [vmem:[#allocation8_spill] sm:$0xff] (%p262_p4), %v4899_v21  ;;  %6589 = vst [vmem:[#allocation13_spill] sm:$0xff] (%p262_p4), %v4918_v16  ;;  %v4938_v52 = vand.u32 (%p262_p4), 4294901760, %v4899_v21  ;;  %4172 = vmatpush3.msra.mxu0 (%p262_p4), %v4869_v42 }
  0xb8   : >> { %v300_v55 = vadd.f32 %v299_v54, %v298_v53  ;;  %6591 = vst [vmem:[#allocation15_spill] sm:$0xff] (%p262_p4), %v4938_v52 }
  0xba   : >> { %v301_v56 = vrot.slane %v300_v55, 1 }
  0xbc   : >> { %v302_v57 = vadd.f32 %v301_v56, %v300_v55 }
  0xbe   : >> { %v305_v60 = vmul.f32 2.0, %v302_v57 }
 0x13b   : >> { %v287_v43 = vpop.xlane.xlu0 %286 }
 0x13c   : >> { %v288_v44 = vrot.slane %v287_v43, 4 }
 0x13e   : >> { %v289_v45 = vadd.f32 %v288_v44, %v287_v43  ;;  %v4872_v43 = vand.u32 (%p262_p4), 4294901760, %v4793_v15  ;;  %v4875_v44 = vand.u32 (%p262_p4), 4294901760, %v4781_v14 }
 0x140   : >> { %v290_v46 = vrot.slane %v289_v45, 2  ;;  %6579 = vst [vmem:[#allocation3_spill] sm:$0xff] (%p262_p4), %v4872_v43  ;;  %6580 = vst [vmem:[#allocation4_spill] sm:$0xff] (%p262_p4), %v4875_v44  ;;  %4173 = vmatprep.subr.mxu0 (%p262_p4), %v4872_v43 }
 0x141   : > { %4174 = vmatpush3.msra.mxu0 (%p262_p4), %v4872_v43 }
 0x142   : >> { %v291_v47 = vadd.f32 %v290_v46, %v289_v45  ;;  %v4888_v45 = vsub.f32 (%p262_p4), %v4801_v19, %v4863_v40  ;;  %v4892_v46 = vsub.f32 (%p262_p4), %v4797_v17, %v4866_v41  ;;  %v4905_v19 = vand.u32 (%p262_p4), 4294901760, %v4880_v11  ;;  %4175 = vmatprep.subr.mxu0 (%p262_p4), %v4875_v44 }
 0x143   : > { %4176 = vmatpush3.msra.mxu0 (%p262_p4), %v4875_v44 }
 0x144   : >> { %v292_v48 = vrot.slane %v291_v47, 1  ;;  %6582 = vst [vmem:[#allocation6_spill] sm:$0xff] (%p262_p4), %v4888_v45  ;;  %6583 = vst [vmem:[#allocation7_spill] sm:$0xff] (%p262_p4), %v4892_v46  ;;  %4177 = vmatprep.subr.mxu0 (%p262_p4), %v4918_v16 }
 0x145   : > { %6585 = vst [vmem:[#allocation9_spill] sm:$0xff] (%p262_p4), %v4905_v19  ;;  %4178 = vmatpush3.msra.mxu0 (%p262_p4), %v4918_v16 }
 0x146   : >> { %v293_v49 = vadd.f32 %v292_v48, %v291_v47  ;;  %v4928_v48 = vsub.f32 (%p262_p4), %v4793_v15, %v4872_v43  ;;  %4201 = vmatprep.subr.mxu0 (%p262_p4), %v4880_v11 }
 0x148   : >> { %4575 = vpush %v293_v49  ;;  %6590 = vst [vmem:[#allocation14_spill] sm:$0xff] (%p262_p4), %v4928_v48  ;;  %v458_v49 = vsub.f32 (%p262_p4), %v4880_v11, %v4905_v19 }
 0x14a   : > { %v4948_v54 = vand.u32 (%p262_p4), 4294901760, %v458_v49 }
 0x14c   : > { %4182 = vmatprep.subr.mxu1 (%p262_p4), %v4948_v54 }
 0x14d   : > { %4183 = vmatpush3.msra.mxu1 (%p262_p4), %v4948_v54 }
 0x179   : >> { %s4576_s26 = spop %4575 }
 0x17a   : >> { %v303_v58 = vstv %s4576_s26 }
 0x17b   : >> { %v304_v59 = vadd.f32 %v303_v58, %v4808_v28 }
 0x17d   : >> { %v306_v61 = vsub.f32 %v304_v59, %v305_v60  ;;  %v4960_v59 = vand.u32 (%p262_p4), 4294901760, %v4928_v48 }
 0x17f   : >> { %v307_v29 = vmin.f32 %v4670_v29, %v306_v61   ;;  %6592 = vst [vmem:[#allocation16_spill] sm:$0xff] (%p262_p4), %v4960_v59  ;;  %v486_v61 = vsub.f32 (%p262_p4), %v4899_v21, %v4938_v52 }
 0x181   : >> { %v309_v62 = vsel %vm308_vm5, %v307_v29, -inf }
 0x182   : >> { %310 = vmax.xlane.f32.xlu1 %v309_v62  ;;  %v4970_v62 = vsub.f32 (%p262_p4), %v4781_v14, %v4875_v44 }
 0x184   : > { %6593 = vst [vmem:[#allocation17_spill] sm:$0xff] (%p262_p4), %v4970_v62  ;;  %v4985_v14 = vand.u32 (%p262_p4), 4294901760, %v4970_v62 }
 0x186   : > { %6595 = vst [vmem:[#allocation19_spill] sm:$0xff] (%p262_p4), %v4985_v14 }
 0x20b   : >> { %v311_v63 = vpop.xlane.xlu1 %310 }
 0x20c   : >> { %4577 = vpush %v311_v63  ;;  %v4974_v63 = vsub.f32 (%p262_p4), %v4779_v13, %v4918_v16 }
 0x20e   : > { %6594 = vst [vmem:[#allocation18_spill] sm:$0xff] (%p262_p4), %v4974_v63 }
 0x23d   : >> { %s4578_s27 = spop %4577 }
 0x23e   : >> { %v313_v2 = vstv %s4578_s27 }
 0x23f   : >> { %vm314_vm6 = vcmp.eq.f32.partialorder %v307_v29, %v313_v2  ;;  %v4884_v29 = vsub.f32 (%p262_p4), %v4803_v20, %v4860_v39  ;;  %v4911_v20 = vand.u32 (%p262_p4), 4294901760, %v4888_v45 }
 0x240   : >> { %v315_v18 = vsel %vm314_vm6, %v4759_v8, 64  ;;  %v6528_v8 = vmov (%p262_p4), 0.0  }
 0x241   : >> { %v316_v22 = vsel %vm308_vm5, %v315_v18, 2147483647  ;;  %6581 = vst [vmem:[#allocation5_spill] sm:$0xff] (%p262_p4), %v4884_v29  ;;  %v4908_v17 = vand.u32 (%p262_p4), 4294901760, %v4884_v29  ;;  %6587 = vst [vmem:[#allocation11_spill] sm:$0xff] (%p262_p4), %v4911_v20  ;;  %v4924_v47 = vsel (%p262_p4), %vm333_vm9, 1.0, %v6528_v8  ;;  %v472_v51 = vsub.f32 (%p262_p4), %v4888_v45, %v4911_v20 }
 0x242   : >> { %v318_v23 = vshra.s32 %v316_v22, 16  ;;  %v317_v25 = vand.u32 65535, %v316_v22  ;;  %v343_v53 = vsel (%p262_p4), %vm308_vm5, %v4924_v47, 0 }
 0x243   : > { %6586 = vst [vmem:[#allocation10_spill] sm:$0xff] (%p262_p4), %v4908_v17  ;;  %v465_v50 = vsub.f32 (%p262_p4), %v4884_v29, %v4908_v17  ;;  %v4957_v58 = vsub.f32 (%p262_p4), %v343_v53, %v343_v53  ;;  %v4964_v60 = vand.u32 (%p262_p4), 4294901760, %v472_v51 }
 0x244   : >> { %v320_v24 = vcvt.s32.f32 %v318_v23  ;;  %v319_v27 = vcvt.s32.f32 %v317_v25  ;;  %v4998_v25 = vand.u32 (%p262_p4), 4294901760, %v4974_v63 }
 0x245   : > { %v4950_v55 = vand.u32 (%p262_p4), 4294901760, %v465_v50  ;;  %v430_v18 = vand.u32 (%p262_p4), 4294901760, %v4957_v58 }
 0x246   : >> { %321 = vmin.xlane.f32.xlu1 %v320_v24  ;;  %6596 = vst [vmem:[#allocation20_spill] sm:$0xff] (%p262_p4), %v4998_v25 }
 0x247   : > { %4184 = vmatprep.subr.mxu1 (%p262_p4), %v4950_v55  ;;  %v431_v23 = vsub.f32 (%p262_p4), %v4957_v58, %v430_v18 }
 0x248   : > { %4185 = vmatpush3.msra.mxu1 (%p262_p4), %v4950_v55 }
 0x249   : > { %4186 = vmatprep.subr.mxu1 (%p262_p4), %v4964_v60 }
 0x24a   : > { %4187 = vmatpush3.msra.mxu1 (%p262_p4), %v4964_v60 }
 0x2cf   : >> { %v322_v26 = vpop.xlane.xlu1 %321 }
 0x2d0   : >> { %vm323_vm7 = vcmp.eq.f32.partialorder %v320_v24, %v322_v26  ;;  %v328_v31 = vcvt.f32.s32 %v322_v26  ;;  %v493_v24 = vsub.f32 (%p262_p4), %v4928_v48, %v4960_v59  ;;  %v5002_v26 = vand.u32 (%p262_p4), 4294901760, %v486_v61 }
 0x2d1   : >> { %v324_v30 = vsel %vm323_vm7, %v319_v27, inf }
 0x2d2   : >> { %325 = vmin.xlane.f32.xlu0 %v324_v30  ;;  %v329_v33 = vshll.u32 %v328_v31, 16  ;;  %v6576_v30 = vmov %v6575_v37  ;;  %v6577_v31 = vmov %v6574_v36  ;;  %v4914_v36 = vand.u32 (%p262_p4), 4294901760, %v4892_v46 }
 0x2d3   : > { %v4921_v37 = vsel (%p262_p4), %vm332_vm8, 1.0, %v6528_v8  ;;  %v432_v30 = vand.u32 (%p262_p4), 4294901760, %v431_v23  ;;  %v500_v31 = vsub.f32 (%p262_p4), %v4970_v62, %v4985_v14 }
 0x2d4   : > { %6588 = vst [vmem:[#allocation12_spill] sm:$0xff] (%p262_p4), %v4914_v36  ;;  %v340_v15 = vsel (%p262_p4), %vm308_vm5, %v4921_v37, 0  ;;  %4198 = vmatprep.mubr.msk.f32.mxu1 (%p262_p4), %vm308_vm5, %v4921_v37  ;;  %v479_v56 = vsub.f32 (%p262_p4), %v4892_v46, %v4914_v36 }
 0x2d5   : > { %v4955_v57 = vsub.f32 (%p262_p4), %v340_v15, %v340_v15 }
 0x2d6   : > { %v4982_v22 = vand.u32 (%p262_p4), 4294901760, %v479_v56 }
 0x2d7   : > { %v420_v2 = vand.u32 (%p262_p4), 4294901760, %v4955_v57 }
 0x2d8   : > { %4188 = vmatprep.subr.mxu1 (%p262_p4), %v4982_v22 }
 0x2d9   : > { %v421_v13 = vsub.f32 (%p262_p4), %v4955_v57, %v420_v2  ;;  %4189 = vmatpush3.msra.mxu1 (%p262_p4), %v4982_v22 }
 0x2da   : > { %4190 = vmatprep.subr.mxu1 (%p262_p4), %v5002_v26 }
 0x2db   : > { %v422_v27 = vand.u32 (%p262_p4), 4294901760, %v421_v13  ;;  %4191 = vmatpush3.msra.mxu1 (%p262_p4), %v5002_v26 }
 0x2dd   : > { %4179 = vmatprep.mubr.f32.mxu0 (%p262_p4), %v422_v27 }
 0x2de   : > { %4180 = vmatmul.mubr.f32.vlgmr.msra.gmra.mxu0 (%p262_p4), %v432_v30 }
 0x2df   : > { %4202 = vmatpush3.msra.mxu0 (%p262_p4), %v4880_v11  ;;  %4217 = vmatprep.mubr.f32.mxu0 (%p262_p4), %v4955_v57 }
 0x2e0   : > { %4203 = vmatprep.subr.mxu0 (%p262_p4), %v4884_v29 }
 0x2e1   : > { %4204 = vmatpush3.msra.mxu0 (%p262_p4), %v4884_v29 }
 0x2e2   : > { %4205 = vmatprep.subr.mxu0 (%p262_p4), %v4888_v45 }
 0x2e3   : > { %4206 = vmatpush3.msra.mxu0 (%p262_p4), %v4888_v45 }
 0x2e4   : > { %4207 = vmatprep.subr.mxu0 (%p262_p4), %v4892_v46 }
 0x2e5   : > { %4208 = vmatpush3.msra.mxu0 (%p262_p4), %v4892_v46 }
 0x2e6   : > { %4209 = vmatprep.subr.mxu0 (%p262_p4), %v4899_v21 }
 0x2e7   : > { %4210 = vmatpush3.msra.mxu0 (%p262_p4), %v4899_v21 }
 0x2e8   : > { %4211 = vmatprep.subr.mxu0 (%p262_p4), %v4928_v48 }
 0x2e9   : > { %4212 = vmatpush3.msra.mxu0 (%p262_p4), %v4928_v48 }
 0x2ea   : > { %4213 = vmatprep.subr.mxu0 (%p262_p4), %v4970_v62 }
 0x2eb   : > { %4214 = vmatpush3.msra.mxu0 (%p262_p4), %v4970_v62 }
 0x2ec   : > { %4215 = vmatprep.subr.mxu0 (%p262_p4), %v4974_v63 }
 0x2ed   : > { %4216 = vmatpush3.msra.mxu0 (%p262_p4), %v4974_v63 }
 0x2ee   : > { %4218 = vmatmul.mubr.f32.vlgmr.msra.gmra.mxu0 (%p262_p4), %v4957_v58  ;;  %4239 = vmatprep.subr.mxu0 (%p262_p4), %v4905_v19 }
 0x2ef   : > { %4240 = vmatpush3.msra.mxu0 (%p262_p4), %v4905_v19  ;;  %4255 = vmatprep.mubr.msk.f32.mxu0 (%p262_p4), %vm308_vm5, %v4921_v37 }
 0x2f0   : > { %4241 = vmatprep.subr.mxu0 (%p262_p4), %v4908_v17 }
 0x2f1   : > { %4242 = vmatpush3.msra.mxu0 (%p262_p4), %v4908_v17 }
 0x2f2   : > { %4243 = vmatprep.subr.mxu0 (%p262_p4), %v4911_v20 }
 0x2f3   : > { %4244 = vmatpush3.msra.mxu0 (%p262_p4), %v4911_v20 }
 0x2f4   : > { %4245 = vmatprep.subr.mxu0 (%p262_p4), %v4914_v36 }
 0x2f5   : > { %4246 = vmatpush3.msra.mxu0 (%p262_p4), %v4914_v36 }
 0x2f6   : > { %4247 = vmatprep.subr.mxu0 (%p262_p4), %v4938_v52 }
 0x2f7   : > { %4248 = vmatpush3.msra.mxu0 (%p262_p4), %v4938_v52 }
 0x2f8   : > { %4249 = vmatprep.subr.mxu0 (%p262_p4), %v4960_v59 }
 0x2f9   : > { %4250 = vmatpush3.msra.mxu0 (%p262_p4), %v4960_v59 }
 0x2fa   : > { %4251 = vmatprep.subr.mxu0 (%p262_p4), %v4985_v14 }
 0x2fb   : > { %4252 = vmatpush3.msra.mxu0 (%p262_p4), %v4985_v14 }
 0x2fc   : > { %4253 = vmatprep.subr.mxu0 (%p262_p4), %v4998_v25 }
 0x2fd   : > { %4254 = vmatpush3.msra.mxu0 (%p262_p4), %v4998_v25 }
 0x2fe   : > { %4256 = vmatmul.mubr.msk.f32.vlgmr.msra.gmra.mxu0 (%p262_p4), %vm308_vm5, %v4924_v47 }
 0x35b   : >> { %v326_v32 = vpop.xlane.xlu0 %325 }
 0x35c   : >> { %v327_v34 = vcvt.f32.s32 %v326_v32  ;;  %v5012_v32 = vand.u32 (%p262_p4), 4294901760, %v493_v24 }
 0x35e   : >> { %v330_v35 = vadd.s32 %v329_v33, %v327_v34  ;;  %v507_v33 = vsub.f32 (%p262_p4), %v4974_v63, %v4998_v25  ;;  %v5018_v34 = vand.u32 (%p262_p4), 4294901760, %v500_v31  ;;  %4192 = vmatprep.subr.mxu1 (%p262_p4), %v5012_v32 }
 0x35f   : > { %4193 = vmatpush3.msra.mxu1 (%p262_p4), %v5012_v32 }
 0x360   : >> { %4579 = vpush %v330_v35  ;;  %v5024_v35 = vand.u32 (%p262_p4), 4294901760, %v507_v33  ;;  %4194 = vmatprep.subr.mxu1 (%p262_p4), %v5018_v34 }
 0x361   : > { %4195 = vmatpush3.msra.mxu1 (%p262_p4), %v5018_v34 }
 0x362   : > { %4196 = vmatprep.subr.mxu1 (%p262_p4), %v5024_v35 }
 0x363   : > { %4197 = vmatpush3.msra.mxu1 (%p262_p4), %v5024_v35 }
 0x364   : > { %4199 = vmatmul.mubr.msk.f32.vlgmr.msra.gmra.mxu1 (%p262_p4), %vm308_vm5, %v4924_v47  ;;  %4220 = vmatprep.subr.mxu1 (%p262_p4), %v4857_v38 }
 0x365   : > { %4221 = vmatpush3.msra.mxu1 (%p262_p4), %v4857_v38  ;;  %4236 = vmatprep.mubr.f32.mxu1 (%p262_p4), %v420_v2 }
 0x366   : > { %4222 = vmatprep.subr.mxu1 (%p262_p4), %v4860_v39 }
 0x367   : > { %4223 = vmatpush3.msra.mxu1 (%p262_p4), %v4860_v39 }
 0x368   : > { %4224 = vmatprep.subr.mxu1 (%p262_p4), %v4863_v40 }
 0x369   : > { %4225 = vmatpush3.msra.mxu1 (%p262_p4), %v4863_v40 }
 0x36a   : > { %4226 = vmatprep.subr.mxu1 (%p262_p4), %v4866_v41 }
 0x36b   : > { %4227 = vmatpush3.msra.mxu1 (%p262_p4), %v4866_v41 }
 0x36c   : > { %4228 = vmatprep.subr.mxu1 (%p262_p4), %v4869_v42 }
 0x36d   : > { %4229 = vmatpush3.msra.mxu1 (%p262_p4), %v4869_v42 }
 0x36e   : > { %4230 = vmatprep.subr.mxu1 (%p262_p4), %v4872_v43 }
 0x36f   : > { %4231 = vmatpush3.msra.mxu1 (%p262_p4), %v4872_v43 }
 0x370   : > { %4232 = vmatprep.subr.mxu1 (%p262_p4), %v4875_v44 }
 0x371   : > { %4233 = vmatpush3.msra.mxu1 (%p262_p4), %v4875_v44 }
 0x372   : > { %4234 = vmatprep.subr.mxu1 (%p262_p4), %v4918_v16 }
 0x373   : > { %4235 = vmatpush3.msra.mxu1 (%p262_p4), %v4918_v16 }
 0x374   : > { %4237 = vmatmul.mubr.f32.vlgmr.msra.gmra.mxu1 (%p262_p4), %v430_v18  ;;  %4258 = vmatprep.subr.mxu1 (%p262_p4), %v4857_v38 }
 0x375   : > { %4259 = vmatpush3.msra.mxu1 (%p262_p4), %v4857_v38  ;;  %4274 = vmatprep.mubr.msk.f32.mxu1 (%p262_p4), %vm308_vm5, %v4921_v37  ;;  %v960_v37 = vsel (%p262_p4), %vm958_vm10, %v4777_v12, 0 }
 0x376   : > { %4260 = vmatprep.subr.mxu1 (%p262_p4), %v4860_v39  ;;  %v5109_v15 = vand.u32 (%p262_p4), 4294901760, %v960_v37 }
 0x377   : > { %4261 = vmatpush3.msra.mxu1 (%p262_p4), %v4860_v39 }
 0x378   : > { %4262 = vmatprep.subr.mxu1 (%p262_p4), %v4863_v40  ;;  %v5112_v56 = vsub.f32 (%p262_p4), %v960_v37, %v5109_v15  ;;  %4277 = vmatprep.subr.mxu0 (%p262_p4), %v5109_v15 }
 0x379   : > { %4263 = vmatpush3.msra.mxu1 (%p262_p4), %v4863_v40  ;;  %4278 = vmatpush3.msra.mxu0 (%p262_p4), %v5109_v15 }
 0x37a   : > { %4264 = vmatprep.subr.mxu1 (%p262_p4), %v4866_v41  ;;  %v5117_v58 = vand.u32 (%p262_p4), 4294901760, %v5112_v56  ;;  %4287 = vmatprep.subr.mxu0 (%p262_p4), %v5112_v56 }
 0x37b   : > { %4265 = vmatpush3.msra.mxu1 (%p262_p4), %v4866_v41 }
 0x37c   : > { %4266 = vmatprep.subr.mxu1 (%p262_p4), %v4869_v42  ;;  %v1082_v12 = vsub.f32 (%p262_p4), %v5112_v56, %v5117_v58 }
 0x37d   : > { %4267 = vmatpush3.msra.mxu1 (%p262_p4), %v4869_v42 }
 0x37e   : > { %4268 = vmatprep.subr.mxu1 (%p262_p4), %v4872_v43  ;;  %v1083_v13 = vand.u32 (%p262_p4), 4294901760, %v1082_v12 }
 0x37f   : > { %4269 = vmatpush3.msra.mxu1 (%p262_p4), %v4872_v43 }
 0x380   : > { %4270 = vmatprep.subr.mxu1 (%p262_p4), %v4875_v44 }
 0x381   : > { %4271 = vmatpush3.msra.mxu1 (%p262_p4), %v4875_v44 }
 0x382   : > { %4272 = vmatprep.subr.mxu1 (%p262_p4), %v4918_v16 }
 0x383   : > { %4273 = vmatpush3.msra.mxu1 (%p262_p4), %v4918_v16 }
 0x384   : > { %4275 = vmatmul.mubr.msk.f32.vlgmr.msra.gmra.mxu1 (%p262_p4), %vm308_vm5, %v4924_v47  ;;  %4282 = vmatprep.subr.mxu1 (%p262_p4), %v1083_v13 }
 0x385   : > { %4283 = vmatpush3.msra.mxu1 (%p262_p4), %v1083_v13 }
 0x386   : > { %4292 = vmatprep.subr.mxu1 (%p262_p4), %v5109_v15 }
 0x38d   : > { %264 = sbr.rel (!%p262_p4) target bundleno = 31 (0x1f), region = 84 }
 0x391   : >> { %s4580_s16 = spop %4579  }
 0x39e   : > { %v4181_v49 = vpop.f32.mrf.mxu0 }
 0x3a0   : > { %v424_v50 = vpop.f32.mrf.mxu0 }
 0x3ae   : > { %v4219_v53 = vpop.f32.mrf.mxu0 }
 0x3b0   : > { %v639_v47 = vpop.f32.mrf.mxu0 }
 0x3be   : > { %v4257_v2 = vpop.f32.mrf.mxu0 }
 0x3c0   : > { %v830_v30 = vpop.f32.mrf.mxu0 }
 0x424   : > { %v4200_v51 = vpop.f32.mrf.mxu1 }
 0x425   : > { %v552_v24 = vadd.f32 %v4200_v51, %v4181_v49 }
 0x426   : > { %v545_v57 = vpop.f32.mrf.mxu1 }
 0x427   : > { %v546_v18 = vadd.f32 %v545_v57, %v424_v50  ;;  %v647_v31 = vadd.f32 %v4219_v53, %v552_v24 }
 0x429   : > { %v640_v27 = vadd.f32 %v639_v47, %v546_v18 }
 0x434   : > { %v4238_v61 = vpop.f32.mrf.mxu1 }
 0x435   : > { %v736_v8 = vadd.f32 %v4238_v61, %v647_v31  ;;  %v4687_v61 = vmov 1966171168  }
 0x436   : > { %v727_v23 = vpop.f32.mrf.mxu1  ;;  %v1550_v12 = vunpack.c.l.s4 %v4687_v61 }
 0x437   : > { %v728_v33 = vadd.f32 %v727_v23, %v640_v27  ;;  %v837_v59 = vadd.f32 %v4257_v2, %v736_v8 }
 0x438   : > { %v1551_v31 = vunpack.c.0.s8 %v1550_v12 }
 0x439   : > { %v831_v25 = vadd.f32 %v830_v30, %v728_v33 }
 0x444   : > { %v4276_v37 = vpop.f32.mrf.mxu1 }
 0x445   : > { %v5125_v50 = vadd.f32 %v4276_v37, %v837_v59 }
 0x446   : > { %v915_v14 = vpop.f32.mrf.mxu1 }
 0x447   : > { %v5123_v52 = vadd.f32 %v915_v14, %v831_v25  ;;  %v937_v51 = vmul.f32 %v5125_v50, %v5125_v50 }
 0x449   : > { %927 = vrot.lane.b32.xlu0 %v5123_v52, %s4686_s28  ;;  %v936_v49 = vmul.f32 %v5123_v52, %v5123_v52 }
 0x44b   : > { %940 = vrot.lane.b32.xlu1 %v936_v49, %s4686_s28 }
 0x44d   : > { %929 = vrot.lane.b32.xlu0 %v5125_v50, %s4686_s28 }
 0x44f   : > { %942 = vrot.lane.b32.xlu1 %v937_v51, %s4686_s28  ;;  %v5144_v51 = vsub.s32 %v1551_v31, %v4766_v10 }
 0x4bb   : > { %v928_v8 = vpop.permute.xlu0 %927 }
 0x4bc   : > { %934 = vst.msk [vmem:[%s4786_s21] sm:$0xff] %vm933_vm11, %v928_v8  ;;  %v954_v59 = vsel %vm933_vm11, %v928_v8, 0 }
 0x4bd   : > { %v1028_v14 = vand.u32 4294901760, %v954_v59  ;;  %v941_v25 = vpop.permute.xlu1 %940 }
 0x4be   : > { %v946_v53 = vsel %vm933_vm11, %v941_v25, 0.0  ;;  %v3524_v25 = vcombine.high %v5123_v52, %v5123_v52 }
 0x4bf   : > { %v1029_v57 = vsub.f32 %v954_v59, %v1028_v14  ;;  %4284 = vmatprep.mubr.f32.mxu1 %v1028_v14  ;;  %v930_v47 = vpop.permute.xlu0 %929  ;;  %947 = vadd.xlane.f32.xlu0 %v946_v53  ;;  %v3531_v59 = vrot.slane %v5123_v52, %v5144_v51 }
 0x4c0   : > { %935 = vst.msk [vmem:[%s4786_s21 + $0x8] sm:$0xff] %vm933_vm11, %v930_v47  ;;  %v956_v2 = vsel %vm933_vm11, %v930_v47, 0  ;;  %v5169_v12 = vrot.slane %v3524_v25, %v5144_v51 }
 0x4c1   : > { %v1038_v18 = vand.u32 4294901760, %v956_v2  ;;  %v943_v13 = vpop.permute.xlu1 %942  ;;  %v1030_v23 = vand.u32 4294901760, %v1029_v57  ;;  %v3539_v53 = vcombine.high %v3531_v59, %v3531_v59 }
 0x4c2   : > { %v949_v24 = vsel %vm933_vm11, %v943_v13, 0.0 }
 0x4c3   : > { %v1039_v27 = vsub.f32 %v956_v2, %v1038_v18  ;;  %4285 = vmatmul.mubr.f32.vlgmr.msra.gmra.mxu1 %v1038_v18  ;;  %950 = vadd.xlane.f32.xlu1 %v949_v24  ;;  %v1031_v30 = vsub.f32 %v1029_v57, %v1030_v23  ;;  %v5166_v61 = vrot.slane %v3539_v53, %v5144_v51 }
 0x4c4   : > { %4294 = vmatprep.mubr.f32.mxu1 %v1030_v23  ;;  %4293 = vmatpush3.msra.mxu1 %v5109_v15  ;;  %v3540_v2 = vcombine.high %v5169_v12, %v5169_v12  ;;  %v3573_v24 = vcombine.high %v5125_v50, %v5125_v50 }
 0x4c5   : > { %v1040_v33 = vand.u32 4294901760, %v1039_v27  ;;  %v1032_v37 = vand.u32 4294901760, %v1031_v30  ;;  %4302 = vmatprep.subr.mxu1 %v5109_v15 }
 0x4c6   : > { %v3568_v23 = vrot.slane %v3540_v2, %v5144_v51  ;;  %v3909_v2 = vcombine.low %v4737_v3, %v4742_v4 }
 0x4c7   : > { %v1041_v49 = vsub.f32 %v1039_v27, %v1040_v33  ;;  %4279 = vmatprep.mubr.f32.mxu0 %v1032_v37  ;;  %4295 = vmatmul.mubr.f32.vlgmr.msra.gmra.mxu1 %v1040_v33 }
 0x4c8   : > { %4304 = vmatprep.mubr.f32.mxu1 %v1028_v14  ;;  %4303 = vmatpush3.msra.mxu1 %v5109_v15  ;;  %v3547_v15 = vrot.slane %v3531_v59, %v5144_v51  ;;  %v3572_v30 = vcombine.high %v3568_v23, %v3568_v23 }
 0x4c9   : > { %v1042_v8 = vand.u32 4294901760, %v1041_v49  ;;  %4319 = vmatprep.subr.mxu1 %v4857_v38  ;;  %v5206_v49 = vrot.slane %v3573_v24, %v5144_v51 }
 0x4ca   : > { %v3569_v47 = vcombine.high %v3547_v15, %v3547_v15 }
 0x4cb   : > { %4280 = vmatmul.mubr.f32.vlgmr.msra.gmra.mxu0 %v1042_v8  ;;  %4305 = vmatmul.mubr.f32.vlgmr.msra.gmra.mxu1 %v1038_v18  ;;  %v3589_v59 = vcombine.high %v5206_v49, %v5206_v49 }
 0x4cc   : > { %4288 = vmatpush3.msra.mxu0 %v5112_v56  ;;  %4289 = vmatprep.mubr.f32.mxu0 %v1029_v57  ;;  %v5160_v56 = vsub.s32 0, %v4766_v10  ;;  %v6597_v57 = vmov 0.0  }
 0x4cd   : > { %4297 = vmatprep.subr.mxu0 %v5117_v58  ;;  %4320 = vmatpush3.msra.mxu1 %v4857_v38 }
 0x4ce   : > { %4321 = vmatprep.subr.mxu1 %v4860_v39  ;;  %v3625_v52 = vrot.slane %v3547_v15, %v5160_v56  ;;  %v3653_v33 = vrot.slane %v3572_v30, %v5160_v56  ;;  %v3617_v15 = vrot.slane %v3589_v59, %v5144_v51 }
 0x4cf   : > { %4290 = vmatmul.mubr.f32.vlgmr.msra.gmra.mxu0 %v1039_v27  ;;  %4322 = vmatpush3.msra.mxu1 %v4860_v39  ;;  %v3645_v27 = vrot.slane %v3568_v23, %v5160_v56 }
 0x4d0   : > { %4298 = vmatpush3.msra.mxu0 %v5117_v58  ;;  %4299 = vmatprep.mubr.f32.mxu0 %v1028_v14  ;;  %v3633_v58 = vrot.slane %v3569_v47, %v5160_v56  ;;  %v3571_v14 = vcombine.high %v5166_v61, %v5166_v61  ;;  %v3677_v53 = vrot.slane %v3617_v15, %v5160_v56 }
 0x4d1   : > { %4307 = vmatprep.subr.bf16.mxu0 %v6597_v57  ;;  %4323 = vmatprep.subr.mxu1 %v4863_v40 }
 0x4d2   : > { %4324 = vmatpush3.msra.mxu1 %v4863_v40  ;;  %v3637_v13 = vrot.slane %v3571_v14, %v5160_v56  ;;  %v3910_v14 = vcombine.low %v4747_v5, %v4752_v6 }
 0x4d3   : > { %4300 = vmatmul.mubr.f32.vlgmr.msra.gmra.mxu0 %v1038_v18  ;;  %4325 = vmatprep.subr.mxu1 %v4866_v41  ;;  %v5188_v18 = vrot.slane %v5125_v50, %v5144_v51 }
 0x4d4   : > { %3686 = vrot.lane.b32.xlu1 %v3625_v52, %s4688_s29  ;;  %4326 = vmatpush3.msra.mxu1 %v4866_v41  ;;  %v3621_v52 = vcombine.high %v3617_v15, %v3617_v15 }
 0x4d5   : > { %4327 = vmatprep.subr.mxu1 %v4869_v42  ;;  %v3588_v31 = vcombine.high %v5188_v18, %v5188_v18  ;;  %4315 = vmatprep.mubr.msk.bf16.mxu0 %vm4689_vm12, %v6597_v57 }
 0x4d6   : > { %4328 = vmatpush3.msra.mxu1 %v4869_v42  ;;  %v3685_v47 = vrot.slane %v3621_v52, %v5160_v56 }
 0x4d7   : > { %4329 = vmatprep.subr.mxu1 %v4872_v43  ;;  %v3610_v37 = vrot.slane %v3588_v31, %v5144_v51 }
 0x4d8   : > { %3690 = vrot.lane.b32.xlu1 %v3633_v58, %s4688_s29  ;;  %4330 = vmatpush3.msra.mxu1 %v4872_v43  ;;  %v3911_v58 = vcombine.low %v4757_v7, %v4764_v9 }
 0x4d9   : > { %4331 = vmatprep.subr.mxu1 %v4875_v44  ;;  %v3661_v8 = vrot.slane %v3610_v37, %v5160_v56  ;;  %v3620_v50 = vcombine.high %v3610_v37, %v3610_v37 }
 0x4da   : > { %4332 = vmatpush3.msra.mxu1 %v4875_v44  ;;  %4308 = vmatpush3.bf16.msra.mxu0 %v3911_v58 }
 0x4db   : > { %4333 = vmatprep.subr.mxu1 %v4918_v16  ;;  %v3669_v25 = vrot.slane %v3620_v50, %v5160_v56  ;;  %4309 = vmatprep.subr.bf16.mxu0 %v6597_v57 }
 0x4dc   : > { %3692 = vrot.lane.b32.xlu1 %v3637_v13, %s4688_s29  ;;  %4334 = vmatpush3.msra.mxu1 %v4918_v16  ;;  %v3908_v13 = vcombine.low %v4727_v0, %v4732_v1 }
 0x4dd   : > { %4399 = vmatprep.subr.mxu1 %v4880_v11 }
 0x4de   : > { %4310 = vmatpush3.bf16.msra.mxu0 %v3910_v14 }
 0x4df   : > { %4311 = vmatprep.subr.bf16.mxu0 %v6597_v57 }
 0x4e0   : > { %3696 = vrot.lane.b32.xlu1 %v3645_v27, %s4688_s29 }
 0x4e2   : > { %4312 = vmatpush3.bf16.msra.mxu0 %v3909_v2 }
 0x4e3   : > { %4313 = vmatprep.subr.bf16.mxu0 %v6597_v57 }
 0x4e4   : > { %3700 = vrot.lane.b32.xlu1 %v3653_v33, %s4688_s29 }
 0x4e6   : > { %4314 = vmatpush3.bf16.msra.mxu0 %v3908_v13 }
 0x4e7   : > { %4359 = vmatprep.subr.mxu0 %v4948_v54 }
 0x4e8   : > { %3704 = vrot.lane.b32.xlu1 %v3661_v8, %s4688_s29 }
 0x4ec   : > { %3708 = vrot.lane.b32.xlu1 %v3669_v25, %s4688_s29 }
 0x4f0   : > { %3712 = vrot.lane.b32.xlu1 %v3677_v53, %s4688_s29 }
 0x4f4   : > { %3716 = vrot.lane.b32.xlu1 %v3685_v47, %s4688_s29 }
 0x548   : > { %v948_v52 = vpop.xlane.xlu0 %947 }
 0x549   : > { %v952_v13 = vadd.f32 %v948_v52, %v4808_v28 }
 0x54c   : > { %v951_v59 = vpop.xlane.xlu1 %950 }
 0x54d   : > { %v953_v58 = vadd.f32 %v951_v59, %v4808_v28 }
 0x583   : > { %v4286_v7 = vpop.f32.mrf.mxu1 }
 0x585   : > { %v1120_v5 = vpop.f32.mrf.mxu1 }
 0x587   : > { %v4296_v6 = vpop.f32.mrf.mxu1 }
 0x589   : > { %v1281_v27 = vpop.f32.mrf.mxu1 }
 0x58b   : > { %v4281_v9 = vpop.f32.mrf.mxu0  ;;  %v4306_v0 = vpop.f32.mrf.mxu1 }
 0x58c   : > { %v1127_v24 = vadd.f32 %v4286_v7, %v4281_v9 }
 0x58d   : > { %v1034_v23 = vpop.f32.mrf.mxu0  ;;  %v1441_v47 = vpop.f32.mrf.mxu1 }
 0x58e   : > { %v1121_v4 = vadd.f32 %v1120_v5, %v1034_v23 }
 0x58f   : > { %v4291_v3 = vpop.f32.mrf.mxu0 }
 0x590   : > { %v1208_v30 = vadd.f32 %v4291_v3, %v1127_v24 }
 0x591   : > { %v1200_v31 = vpop.f32.mrf.mxu0 }
 0x592   : > { %v1201_v33 = vadd.f32 %v1200_v31, %v1121_v4  ;;  %v1290_v37 = vadd.f32 %v4296_v6, %v1208_v30 }
 0x593   : > { %v4301_v1 = vpop.f32.mrf.mxu0 }
 0x594   : > { %v1370_v8 = vadd.f32 %v4301_v1, %v1290_v37  ;;  %v1282_v50 = vadd.f32 %v1281_v27, %v1201_v33  ;;  %v4690_v33 = vmov 0  }
 0x595   : > { %v1363_v25 = vpop.f32.mrf.mxu0 }
 0x596   : > { %v1448_v15 = vadd.f32 %v4306_v0, %v1370_v8  ;;  %v1364_v53 = vadd.f32 %v1363_v25, %v1282_v50 }
 0x598   : > { %v1452_v14 = vmul.f32 2.0, %v1448_v15  ;;  %v1442_v2 = vadd.f32 %v1441_v47, %v1364_v53 }
 0x59a   : > { %v1454_v7 = vsub.f32 %v953_v58, %v1452_v14  ;;  %v1451_v5 = vmul.f32 2.0, %v1442_v2 }
 0x59c   : > { %v1453_v9 = vsub.f32 %v952_v13, %v1451_v5  ;;  %vm5235_vm13 = vcmp.le.f32.partialorder %v1454_v7, 0.16 }
 0x59d   : > { %v3907_v28 = vsel %vm5235_vm13, 1.0, %v6597_v57  ;;  %v1458_v37 = vsel %vm5235_vm13, 1, %v4690_v33 }
 0x59e   : > { %vm5239_vm14 = vcmp.le.f32.partialorder %v1453_v9, 0.16  ;;  %v1533_v4 = vsel %vm308_vm5, %v3907_v28, 0.0  ;;  %v1798_v0 = vrot.slane %v1458_v37, %v5144_v51  ;;  %v1791_v50 = vcombine.high %v1458_v37, %v1458_v37 }
 0x59f   : > { %v3906_v24 = vsel %vm5239_vm14, 1.0, %v6597_v57  ;;  %v1544_v37 = vadd.s32 1, %v4766_v10 }
 0x5a0   : > { %v1530_v27 = vsel %vm308_vm5, %v3906_v24, 0.0  ;;  %v1461_v3 = vpack.c.bf16 %v3907_v28, %v3906_v24  ;;  %v1806_v59 = vcombine.high %v1798_v0, %v1798_v0  ;;  %v1805_v53 = vrot.slane %v1791_v50, %v5144_v51 }
 0x5a1   : > { %1531 = vadd.xlane.f32.xlu0 %v1530_v27  ;;  %v1814_v52 = vrot.slane %v1798_v0, %v5144_v51 }
 0x5a2   : > { %4316 = vmatmul.mubr.msk.bf16.vlgmr.msra.gmra.mxu0 %vm308_vm5, %v1461_v3  ;;  %v1828_v58 = vrot.slane %v1806_v59, %v5144_v51  ;;  %v1821_v13 = vrot.slane %v1805_v53, %v5144_v51  ;;  %v1807_v5 = vcombine.high %v1805_v53, %v1805_v53 }
 0x5a3   : > { %4360 = vmatpush3.msra.mxu0 %v4948_v54  ;;  %v3629_v54 = vrot.slane %v5166_v61, %v5160_v56  ;;  %v1836_v9 = vcombine.high %v1814_v52, %v1814_v52  ;;  %vm1848_vm15 = vcmp.ne.s32.totalorder %v1814_v52, 0 }
 0x5a4   : > { %4361 = vmatprep.subr.mxu0 %v4950_v55  ;;  %v1838_v27 = vcombine.high %v1828_v58, %v1828_v58  ;;  %vm1849_vm0 = vcmp.ne.s32.totalorder %v1828_v58, 0  ;;  %vm1852_vm4 = vcmp.ne.s32.totalorder %v1821_v13, 0 }
 0x5a5   : > { %1534 = vadd.xlane.f32.xlu0 %v1533_v4  ;;  %4362 = vmatpush3.msra.mxu0 %v4950_v55  ;;  %v3554_v55 = vrot.slane %v5169_v12, %v5144_v51  ;;  %v3603_v12 = vrot.slane %v5206_v49, %v5144_v51  ;;  %v1457_v49 = vsel %vm5239_vm14, 1, %v4690_v33  ;;  %v1837_v4 = vcombine.high %v1821_v13, %v1821_v13 }
 0x5a6   : > { %4363 = vmatprep.subr.mxu0 %v4964_v60  ;;  %v1742_v1 = vcombine.high %v1457_v49, %v1457_v49  ;;  %v1749_v8 = vrot.slane %v1457_v49, %v5144_v51  ;;  %vm5307_vm3 = vcmp.ne.s32.totalorder %v1836_v9, 0  ;;  %vm5311_vm8 = vcmp.ne.s32.totalorder %v1838_v27, 0 }
 0x5a7   : > { %4364 = vmatpush3.msra.mxu0 %v4964_v60  ;;  %v3641_v60 = vrot.slane %v3554_v55, %v5160_v56  ;;  %v3673_v30 = vrot.slane %v3603_v12, %v5160_v56  ;;  %v3619_v31 = vcombine.high %v3603_v12, %v3603_v12  ;;  %vm5315_vm11 = vcmp.ne.s32.totalorder %v1837_v4, 0 }
 0x5a8   : > { %4365 = vmatprep.subr.mxu0 %v4982_v22  ;;  %v1756_v25 = vrot.slane %v1742_v1, %v5144_v51  ;;  %v1757_v15 = vcombine.high %v1749_v8, %v1749_v8  ;;  %v1765_v47 = vrot.slane %v1749_v8, %v5144_v51  ;;  %v5377_v9 = vsel %vm5311_vm8, 1, %v4690_v33 }
 0x5a9   : > { %4366 = vmatpush3.msra.mxu0 %v4982_v22  ;;  %v3570_v22 = vcombine.high %v3554_v55, %v3554_v55  ;;  %v1835_v55 = vrot.slane %v1807_v5, %v5144_v51  ;;  %v5382_v58 = vsel %vm1852_vm4, 1, %v4690_v33  ;;  %v2016_v4 = vsub.s32 3, %v4766_v10 }
 0x5aa   : > { %4367 = vmatprep.subr.mxu0 %v5002_v26  ;;  %v1758_v14 = vcombine.high %v1756_v25, %v1756_v25  ;;  %v1779_v2 = vrot.slane %v1757_v15, %v5144_v51  ;;  %v1772_v7 = vrot.slane %v1756_v25, %v5144_v51  ;;  %v1787_v24 = vcombine.high %v1765_v47, %v1765_v47 }
 0x5ab   : > { %4368 = vmatpush3.msra.mxu0 %v5002_v26  ;;  %v3649_v26 = vrot.slane %v3570_v22, %v5160_v56  ;;  %vm1840_vm1 = vcmp.ne.s32.totalorder %v1765_v47, 0  ;;  %v2024_v13 = vsub.s32 5, %v4766_v10 }
 0x5ac   : > { %4369 = vmatprep.subr.mxu0 %v5012_v32  ;;  %v1786_v28 = vrot.slane %v1758_v14, %v5144_v51  ;;  %v1789_v3 = vcombine.high %v1779_v2, %v1779_v2  ;;  %vm1841_vm2 = vcmp.ne.s32.totalorder %v1779_v2, 0  ;;  %vm1842_vm6 = vcmp.ne.s32.totalorder %v1787_v24, 0 }
 0x5ad   : > { %4370 = vmatpush3.msra.mxu0 %v5012_v32  ;;  %v3596_v32 = vrot.slane %v5188_v18, %v5144_v51  ;;  %v3681_v18 = vrot.slane %v3619_v31, %v5160_v56  ;;  %vm1844_vm7 = vcmp.ne.s32.totalorder %v1772_v7, 0  ;;  %v1839_v31 = vcombine.high %v1835_v55, %v1835_v55 }
 0x5ae   : > { %4371 = vmatprep.subr.mxu0 %v5018_v34  ;;  %vm1843_vm9 = vcmp.ne.s32.totalorder %v1789_v3, 0  ;;  %vm1845_vm10 = vcmp.ne.s32.totalorder %v1786_v28, 0  ;;  %v5327_v12 = vsel %vm1844_vm7, 1, %v4690_v33  ;;  %v5365_v14 = vsel %vm1849_vm0, 1, %v4690_v33 }
 0x5af   : > { %4372 = vmatpush3.msra.mxu0 %v5018_v34  ;;  %v3657_v34 = vrot.slane %v3596_v32, %v5160_v56  ;;  %v5340_v49 = vsel %vm1843_vm9, 1, %v4690_v33  ;;  %v5343_v0 = vsel %vm1845_vm10, 1, %v4690_v33  ;;  %v5367_v2 = vcvt.s32.f32 %v1544_v37 }
 0x5b0   : > { %4373 = vmatprep.subr.mxu0 %v5024_v35  ;;  %v2008_v24 = vsub.s32 1, %v4766_v10  ;;  %v2012_v3 = vsub.s32 2, %v4766_v10 }
 0x5b1   : > { %4374 = vmatpush3.msra.mxu0 %v5024_v35  ;;  %v3618_v35 = vcombine.high %v3596_v32, %v3596_v32  ;;  %v2028_v32 = vsub.s32 6, %v4766_v10 }
 0x5b2   : > { %4439 = vmatprep.subr.mxu0 %v4857_v38 }
 0x5b3   : > { %v3665_v61 = vrot.slane %v3618_v35, %v5160_v56  ;;  %v5321_v35 = vsel %vm1841_vm2, 1, %v4690_v33  ;;  %vm1855_vm2 = vcmp.ne.s32.totalorder %v1839_v31, 0 }
 0x5bb   : > { %3688 = vrot.lane.b32.xlu0 %v3629_v54, %s4688_s29  ;;  %v1788_v54 = vcombine.high %v1772_v7, %v1772_v7 }
 0x5bd   : > { %vm1846_vm12 = vcmp.ne.s32.totalorder %v1788_v54, 0  ;;  %v2020_v54 = vsub.s32 4, %v4766_v10 }
 0x5be   : > { %v5349_v50 = vsel %vm1846_vm12, 1, %v4690_v33 }
 0x5bf   : > { %3694 = vrot.lane.b32.xlu0 %v3641_v60, %s4688_s29  ;;  %v6646_v46 = vrot.slane %v5349_v50, %v5160_v56 }
 0x5c3   : > { %3698 = vrot.lane.b32.xlu0 %v3649_v26, %s4688_s29  ;;  %v1790_v26 = vcombine.high %v1786_v28, %v1786_v28  ;;  %v5390_v28 = vsel %vm5315_vm11, 1, %v4690_v33 }
 0x5c4   : > { %6609 = vst [vmem:[#allocation22_spill] sm:$0xff] %v5390_v28 }
 0x5c7   : > { %3702 = vrot.lane.b32.xlu0 %v3657_v34, %s4688_s29  ;;  %v1856_v34 = vsel %vm1840_vm1, 1, %v4690_v33  ;;  %vm1853_vm1 = vcmp.ne.s32.totalorder %v1835_v55, 0  ;;  %v5396_v55 = vsel %vm1855_vm2, 1, %v4690_v33 }
 0x5c8   : > { %v1875_v1 = vrot.slane %v1856_v34, %v5160_v56  ;;  %v5385_v27 = vsel %vm1853_vm1, 1, %v4690_v33  ;;  %6610 = vst [vmem:[#allocation23_spill] sm:$0xff] %v5396_v55  ;;  %v2032_v34 = vsub.s32 7, %v4766_v10  ;;  %v6630_v10 = vrot.slane %v5327_v12, %v5160_v56 }
 0x5c9   : > { %6608 = vst [vmem:[#allocation21_spill] sm:$0xff] %v5385_v27 }
 0x5ca   : > { %vm5439_vm4 = vcmp.eq.s32.totalorder %v1875_v1, 1 }
 0x5cb   : > { %3706 = vrot.lane.b32.xlu0 %v3665_v61, %s4688_s29  ;;  %v5324_v61 = vsel %vm1842_vm6, 1, %v4690_v33 }
 0x5cf   : > { %3710 = vrot.lane.b32.xlu0 %v3673_v30, %s4688_s29  ;;  %v5331_v30 = vsel %vm1848_vm15, 1, %v4690_v33  ;;  %vm1847_vm15 = vcmp.ne.s32.totalorder %v1790_v26, 0 }
 0x5d0   : > { %v5372_v5 = vsel %vm1847_vm15, 1, %v4690_v33 }
 0x5d3   : > { %3714 = vrot.lane.b32.xlu0 %v3681_v18, %s4688_s29  ;;  %v5336_v18 = vsel %vm5307_vm3, 1, %v4690_v33 }
 0x62a   : > { %v5357_v53 = vpop.xlane.xlu0 %1531 }
 0x62b   : > { %v2005_v60 = vrot.slane %v5357_v53, %v5160_v56  ;;  %v5422_v31 = vrot.slane %v5357_v53, %v2008_v24  ;;  %v5425_v33 = vrot.slane %v5357_v53, %v2012_v3  ;;  %v5428_v59 = vrot.slane %v5357_v53, %v2016_v4 }
 0x62c   : > { %v5431_v47 = vrot.slane %v5357_v53, %v2020_v54  ;;  %v5435_v52 = vrot.slane %v5357_v53, %v2024_v13  ;;  %v5444_v25 = vrot.slane %v5357_v53, %v2028_v32  ;;  %v5447_v8 = vrot.slane %v5357_v53, %v2032_v34 }
 0x62d   : > { %vm2083_vm2 = vcmp.ge.f32.partialorder %v5422_v31, %v5367_v2 }
 0x62e   : > { %v5411_v37 = vpop.xlane.xlu0 %1534 }
 0x62f   : > { %v5452_v36 = vrot.slane %v5411_v37, %v2008_v24  ;;  %v5459_v53 = vrot.slane %v5411_v37, %v2012_v3  ;;  %v5462_v16 = vrot.slane %v5411_v37, %v2016_v4  ;;  %v5474_v3 = vrot.slane %v5411_v37, %v2020_v54 }
 0x630   : > { %v5505_v21 = vrot.slane %v5411_v37, %v2028_v32 }
 0x632   : > { %6621 = vst [vmem:[#allocation25_spill] sm:$0xff] %v5505_v21 }
 0x662   : > { %v1523_v7 = vpop.f32.mrf.mxu0 }
 0x663   : > { %vm1536_vm0 = vcmp.eq.f32.partialorder %v1523_v7, 1.0  ;;  %v1548_v22 = vcombine.high %v1523_v7, %v1523_v7  ;;  %v1555_v26 = vrot.slane %v1523_v7, %v5144_v51 }
 0x664   : > { %vm1538_vm3 = vmand %vm5239_vm14, %vm1536_vm0  ;;  %v4317_v15 = vpop.f32.mrf.mxu0  ;;  %vm5469_vm14 = vcmp.ge.f32.partialorder %v2005_v60, %v5367_v2 }
 0x665   : > { %v3913_v23 = vsel %vm1538_vm3, 1.0, %v6597_v57  ;;  %v1562_v1 = vrot.slane %v1548_v22, %v5144_v51  ;;  %v1563_v20 = vcombine.high %v1555_v26, %v1555_v26  ;;  %v1571_v17 = vrot.slane %v1555_v26, %v5144_v51 }
 0x666   : > { %v2100_v15 = vcombine.high %v3913_v23, %v3913_v23  ;;  %v2107_v19 = vrot.slane %v3913_v23, %v5144_v51  ;;  %v1526_v63 = vpop.f32.mrf.mxu0  ;;  %vm2084_vm3 = vcmp.ge.f32.partialorder %v5425_v33, %v5367_v2 }
 0x667   : > { %v1564_v7 = vcombine.high %v1562_v1, %v1562_v1  ;;  %v1578_v24 = vrot.slane %v1562_v1, %v5144_v51  ;;  %v1585_v62 = vrot.slane %v1563_v20, %v5144_v51  ;;  %v1593_v44 = vcombine.high %v1571_v17, %v1571_v17 }
 0x668   : > { %v1649_v22 = vrot.slane %v1571_v17, %v5160_v56  ;;  %v2114_v26 = vrot.slane %v2100_v15, %v5144_v51  ;;  %v2115_v48 = vcombine.high %v2107_v19, %v2107_v19  ;;  %v4318_v43 = vpop.f32.mrf.mxu0  ;;  %v5489_v15 = vrot.slane %v2107_v19, %v5144_v51 }
 0x669   : > { %v5477_v4 = vrot.slane %v1564_v7, %v5144_v51  ;;  %v1594_v1 = vcombine.high %v1578_v24, %v1578_v24  ;;  %v1595_v20 = vcombine.high %v1585_v62, %v1585_v62  ;;  %v1653_v55 = vrot.slane %v1585_v62, %v5160_v56 }
 0x66a   : > { %v5481_v17 = vrot.slane %v1593_v44, %v5160_v56  ;;  %vm5484_vm6 = vcmp.eq.f32.partialorder %v1649_v22, %v5367_v2  ;;  %v2116_v60 = vcombine.high %v2114_v26, %v2114_v26  ;;  %v1665_v7 = vrot.slane %v1578_v24, %v5160_v56 }
 0x66b   : > { %v1596_v54 = vcombine.high %v5477_v4, %v5477_v4  ;;  %v6617_v62 = vrot.slane %v5321_v35, %v5160_v56  ;;  %v5502_v22 = vrot.slane %v5411_v37, %v2024_v13  ;;  %v5508_v19 = vrot.slane %v1595_v20, %v5160_v56  ;;  %vm1952_vm9 = vmand %vm5484_vm6, %vm5439_vm4 }
 0x66c   : > { %v5513_v24 = vrot.slane %v2114_v26, %v5144_v51  ;;  %v5516_v35 = vrot.slane %v5411_v37, %v2032_v34  ;;  %vm5522_vm8 = vcmp.eq.f32.partialorder %v1653_v55, %v5367_v2  ;;  %v5531_v32 = vrot.slane %v2115_v48, %v5144_v51 }
 0x66d   : > { %vm5497_vm7 = vcmp.eq.s32.totalorder %v6617_v62, 1  ;;  %6620 = vst [vmem:[#allocation24_spill] sm:$0xff] %v5502_v22  ;;  %v5519_v62 = vrot.slane %v1594_v1, %v5160_v56  ;;  %v5534_v26 = vrot.slane %v2116_v60, %v5144_v51  ;;  %v5537_v34 = vrot.slane %v1596_v54, %v5160_v56 }
 0x66e   : > { %6622 = vst [vmem:[#allocation26_spill] sm:$0xff] %v5516_v35  ;;  %vm1728_vm10 = vcmp.eq.f32.partialorder %v5481_v17, %v5367_v2  ;;  %v2145_v55 = vcombine.high %v5489_v15, %v5489_v15  ;;  %v2201_v1 = vrot.slane %v5489_v15, %v5160_v56  ;;  %vm1537_vm11 = vcmp.eq.f32.partialorder %v1526_v63, 1.0  ;;  %vm1953_vm0 = vmand %vm5522_vm8, %vm5497_vm7 }
 0x66f   : > { %vm5546_vm12 = vcmp.eq.f32.partialorder %v1665_v7, %v5367_v2  ;;  %vm1539_vm15 = vmand %vm5235_vm13, %vm1537_vm11  ;;  %v1597_v7 = vcombine.high %v1526_v63, %v1526_v63  ;;  %v1604_v35 = vrot.slane %v1526_v63, %v5144_v51  ;;  %v3915_v20 = vsel %vm1952_vm9, 1.0, %v6597_v57 }
 0x670   : > { %v3914_v15 = vsel %vm1539_vm15, 1.0, %v6597_v57  ;;  %v6627_v54 = vrot.slane %v5324_v61, %v5160_v56  ;;  %v2205_v6 = vrot.slane %v5531_v32, %v5160_v56  ;;  %v2278_v43 = vsel %vm5469_vm14, %v3915_v20, %v2201_v1 }
 0x671   : > { %v2149_v60 = vcombine.high %v3914_v15, %v3914_v15  ;;  %v2156_v63 = vrot.slane %v3914_v15, %v5144_v51  ;;  %vm5583_vm13 = vcmp.eq.s32.totalorder %v6630_v10, 1  ;;  %v1611_v61 = vrot.slane %v1597_v7, %v5144_v51 }
 0x672   : > { %vm5571_vm1 = vcmp.eq.s32.totalorder %v6627_v54, 1  ;;  %v1612_v54 = vcombine.high %v1604_v35, %v1604_v35  ;;  %v1620_v42 = vrot.slane %v1604_v35, %v5144_v51  ;;  %v2295_v22 = vsel %vm308_vm5, %v2278_v43, 0 }
 0x673   : > { %v2163_v45 = vrot.slane %v2149_v60, %v5144_v51  ;;  %v2164_v15 = vcombine.high %v2156_v63, %v2156_v63  ;;  %v5592_v23 = vrot.slane %v2156_v63, %v5144_v51  ;;  %v5594_v1 = vand.u32 4294901760, %v2295_v22  ;;  %vm1954_vm15 = vmand %vm1728_vm10, %vm5571_vm1 }
 0x674   : > { %v1613_v12 = vcombine.high %v1611_v61, %v1611_v61  ;;  %v5599_v20 = vrot.slane %v1611_v61, %v5144_v51  ;;  %v1634_v7 = vrot.slane %v1612_v54, %v5144_v51  ;;  %v1642_v35 = vcombine.high %v1620_v42, %v1620_v42 }
 0x675   : > { %v6633_v60 = vrot.slane %v5340_v49, %v5160_v56  ;;  %v1681_v43 = vrot.slane %v1620_v42, %v5160_v56  ;;  %v2165_v10 = vcombine.high %v2163_v45, %v2163_v45  ;;  %v5617_v61 = vrot.slane %v2163_v45, %v5144_v51  ;;  %4375 = vmatprep.mubr.f32.mxu0 %v5594_v1 }
 0x676   : > { %v5620_v54 = vrot.slane %v2164_v15, %v5144_v51  ;;  %v5626_v49 = vrot.slane %v1613_v12, %v5144_v51  ;;  %v1644_v28 = vcombine.high %v1634_v7, %v1634_v7  ;;  %v1685_v42 = vrot.slane %v1634_v7, %v5160_v56 }
 0x677   : > { %vm5611_vm4 = vcmp.eq.s32.totalorder %v6633_v60, 1  ;;  %v1643_v60 = vcombine.high %v5599_v20, %v5599_v20  ;;  %v2209_v45 = vrot.slane %v2145_v55, %v5160_v56  ;;  %v5635_v15 = vrot.slane %v1642_v35, %v5160_v56 }
 0x678   : > { %v5638_v27 = vrot.slane %v2165_v10, %v5144_v51  ;;  %v3916_v12 = vsel %vm1953_vm0, 1.0, %v6597_v57  ;;  %v1645_v7 = vcombine.high %v5626_v49, %v5626_v49  ;;  %v5649_v29 = vrot.slane %v1644_v28, %v5160_v56 }
 0x679   : > { %v1697_v55 = vrot.slane %v5599_v20, %v5160_v56  ;;  %vm5654_vm9 = vcmp.eq.f32.partialorder %v1681_v43, %v5367_v2  ;;  %v6638_v13 = vrot.slane %v5343_v0, %v5160_v56  ;;  %v5668_v28 = vrot.slane %v1643_v60, %v5160_v56 }
 0x67a   : > { %vm5671_vm7 = vcmp.eq.f32.partialorder %v1685_v42, %v5367_v2  ;;  %v6643_v43 = vrot.slane %v5331_v30, %v5160_v56  ;;  %v2194_v10 = vcombine.high %v5592_v23, %v5592_v23  ;;  %v5690_v60 = vrot.slane %v1645_v7, %v5160_v56 }
 0x67b   : > { %vm5661_vm11 = vcmp.eq.s32.totalorder %v6638_v13, 1  ;;  %vm5707_vm1 = vcmp.eq.s32.totalorder %v6646_v46, 1  ;;  %v2233_v7 = vrot.slane %v5592_v23, %v5160_v56  ;;  %v6649_v35 = vrot.slane %v5365_v14, %v5160_v56 }
 0x67c   : > { %vm5678_vm8 = vcmp.eq.s32.totalorder %v6643_v43, 1  ;;  %v2237_v43 = vrot.slane %v5620_v54, %v5160_v56  ;;  %v5716_v13 = vrot.slane %v2194_v10, %v5160_v56  ;;  %v2279_v46 = vsel %vm2083_vm2, %v3916_v12, %v2205_v6 }
 0x67d   : > { %vm5723_vm10 = vcmp.eq.s32.totalorder %v6649_v35, 1  ;;  %v3917_v30 = vsel %vm1954_vm15, 1.0, %v6597_v57  ;;  %vm1729_vm6 = vcmp.eq.f32.partialorder %v5508_v19, %v5367_v2  ;;  %v6652_v10 = vcombine.high %v5531_v32, %v5531_v32  ;;  %vm6656_vm15 = vmand %vm5546_vm12, %vm5583_vm13 }
 0x67e   : > { %v6653_v14 = vrot.slane %v5372_v5, %v5160_v56  ;;  %v2298_v31 = vsel %vm308_vm5, %v2279_v46, 0  ;;  %v2280_v19 = vsel %vm2084_vm3, %v3917_v30, %v2209_v45  ;;  %vm1955_vm2 = vmand %vm1729_vm6, %vm5611_vm4  ;;  %v3919_v5 = vsel %vm6656_vm15, 1.0, %v6597_v57 }
 0x67f   : > { %v2213_v42 = vrot.slane %v6652_v10, %v5160_v56  ;;  %v5759_v32 = vsub.f32 %v2295_v22, %v5594_v1  ;;  %v5763_v6 = vand.u32 4294901760, %v2298_v31  ;;  %v2301_v33 = vsel %vm308_vm5, %v2280_v19, 0 }
 0x680   : > { %vm5742_vm0 = vcmp.eq.s32.totalorder %v6653_v14, 1  ;;  %v3918_v63 = vsel %vm1955_vm2, 1.0, %v6597_v57  ;;  %v6657_v45 = vrot.slane %v5513_v24, %v5160_v56  ;;  %vm6658_vm3 = vcmp.ge.f32.partialorder %v5431_v47, %v5367_v2 }
 0x681   : > { %v5773_v48 = vand.u32 4294901760, %v2301_v33  ;;  %vm6659_vm12 = vcmp.ge.f32.partialorder %v5428_v59, %v5367_v2  ;;  %v2417_v30 = vand.u32 4294901760, %v5759_v32  ;;  %vm2089_vm13 = vcmp.ge.f32.partialorder %v5447_v8, %v5367_v2  ;;  %4376 = vmatmul.mubr.f32.vlgmr.msra.gmra.mxu0 %v5763_v6 }
 0x682   : > { %v2282_v21 = vsel %vm6658_vm3, %v3919_v5, %v6657_v45  ;;  %v2281_v22 = vsel %vm6659_vm12, %v3918_v63, %v2213_v42  ;;  %v5783_v46 = vsub.f32 %v2298_v31, %v5763_v6  ;;  %v6660_v59 = vrot.slane %v5477_v4, %v5160_v56  ;;  %4440 = vmatpush3.msra.mxu0 %v4857_v38 }
 0x683   : > { %v2307_v12 = vsel %vm308_vm5, %v2282_v21, 0  ;;  %v2304_v47 = vsel %vm308_vm5, %v2281_v22, 0  ;;  %v6661_v42 = vrot.slane %v5411_v37, %v5160_v56  ;;  %v6664_v31 = vrot.slane %v5336_v18, %v5160_v56  ;;  %4378 = vmatprep.mubr.f32.mxu0 %v5773_v48  ;;  %4441 = vmatprep.subr.mxu0 %v4860_v39 }
 0x684   : > { %v5787_v10 = vand.u32 4294901760, %v2307_v12  ;;  %vm1731_vm4 = vcmp.eq.f32.partialorder %v6660_v59, %v5367_v2  ;;  %v5809_v5 = vand.u32 4294901760, %v2304_v47  ;;  %v2418_v4 = vsub.f32 %v5759_v32, %v2417_v30  ;;  %4442 = vmatpush3.msra.mxu0 %v4860_v39 }
 0x685   : > { %vm5797_vm6 = vcmp.ge.f32.partialorder %v6661_v42, %v5367_v2  ;;  %vm5804_vm2 = vcmp.eq.s32.totalorder %v6664_v31, 1  ;;  %vm1957_vm15 = vmand %vm1731_vm4, %vm5661_vm11  ;;  %v2221_v37 = vrot.slane %v5534_v26, %v5160_v56  ;;  %v5819_v18 = vsub.f32 %v2301_v33, %v5773_v48  ;;  %4443 = vmatprep.subr.mxu0 %v4863_v40 }
 0x686   : > { %vm5825_vm12 = vcmp.eq.f32.partialorder %v1697_v55, %v5367_v2  ;;  %vm1960_vm11 = vmand %vm5654_vm9, %vm5678_vm8  ;;  %v2427_v44 = vand.u32 4294901760, %v5783_v46  ;;  %v3920_v33 = vsel %vm1957_vm15, 1.0, %v6597_v57  ;;  %vm1732_vm4 = vcmp.eq.f32.partialorder %v5519_v62, %v5367_v2  ;;  %4379 = vmatmul.mubr.f32.gmra.mxu0 %v5809_v5 }
 0x687   : > { %v6669_v45 = vcombine.high %v5513_v24, %v5513_v24  ;;  %v2419_v21 = vand.u32 4294901760, %v2418_v4  ;;  %vm6670_vm3 = vcmp.ge.f32.partialorder %v5435_v52, %v5367_v2  ;;  %v2437_v59 = vand.u32 4294901760, %v5819_v18  ;;  %vm1958_vm15 = vmand %vm1732_vm4, %vm5707_vm1  ;;  %4381 = vmatprep.mubr.f32.mxu0 %v5787_v10  ;;  %4444 = vmatpush3.msra.mxu0 %v4863_v40 }
 0x688   : > { %v2283_v22 = vsel %vm6670_vm3, %v3920_v33, %v2221_v37  ;;  %v5849_v42 = vsub.f32 %v2304_v47, %v5809_v5  ;;  %v2428_v24 = vsub.f32 %v5783_v46, %v2427_v44  ;;  %v3921_v52 = vsel %vm1958_vm15, 1.0, %v6597_v57  ;;  %4445 = vmatprep.subr.mxu0 %v4866_v41  ;;  %v6701_v47 = vld [vmem:[#allocation26_spill] sm:$0xff] }
 0x689   : > { %v2225_v55 = vrot.slane %v6669_v45, %v5160_v56  ;;  %v2310_v62 = vsel %vm308_vm5, %v2283_v22, 0  ;;  %vm1733_vm3 = vcmp.eq.f32.partialorder %v5537_v34, %v5367_v2  ;;  %v6671_v17 = vrot.slane %v5382_v58, %v5160_v56  ;;  %4335 = vmatprep.mubr.f32.mxu1 %v2419_v21  ;;  %4446 = vmatpush3.msra.mxu0 %v4866_v41 }
 0x68a   : > { %v5875_v34 = vand.u32 4294901760, %v2310_v62  ;;  %v2438_v31 = vsub.f32 %v5819_v18, %v2437_v59  ;;  %vm6674_vm15 = vcmp.ge.f32.partialorder %v5444_v25, %v5367_v2  ;;  %v2447_v37 = vand.u32 4294901760, %v5849_v42  ;;  %vm1959_vm4 = vmand %vm1733_vm3, %vm5742_vm0 }
 0x68b   : > { %vm5870_vm14 = vcmp.eq.s32.totalorder %v6671_v17, 1  ;;  %v2284_v4 = vsel %vm6674_vm15, %v3921_v52, %v2225_v55  ;;  %v6675_v58 = vrot.slane %v5377_v9, %v5160_v56  ;;  %v2429_v45 = vand.u32 4294901760, %v2428_v24  ;;  %vm6679_vm3 = vmand %vm5671_vm7, %vm5723_vm10 }
 0x68c   : > { %v2313_v21 = vsel %vm308_vm5, %v2284_v4, 0  ;;  %v3922_v22 = vsel %vm1959_vm4, 1.0, %v6597_v57  ;;  %v6678_v25 = vcombine.high %v5534_v26, %v5534_v26  ;;  %v2439_v35 = vand.u32 4294901760, %v2438_v31  ;;  %4382 = vmatmul.mubr.f32.gmra.mxu0 %v5875_v34  ;;  %vm1964_vm4 = vmand %vm5825_vm12, %vm5870_vm14 }
 0x68d   : > { %vm5889_vm1 = vcmp.eq.s32.totalorder %v6675_v58, 1  ;;  %v5900_v52 = vand.u32 4294901760, %v2313_v21  ;;  %v2448_v9 = vsub.f32 %v5849_v42, %v2447_v37  ;;  %v5906_v24 = vsub.f32 %v2307_v12, %v5787_v10  ;;  %4336 = vmatmul.mubr.f32.vlgmr.msra.gmra.mxu1 %v2429_v45  ;;  %v6685_v45 = vld [vmem:[#allocation21_spill] sm:$0xff] }
 0x68e   : > { %v2229_v55 = vrot.slane %v6678_v25, %v5160_v56  ;;  %vm2093_vm0 = vcmp.ge.f32.partialorder %v5462_v16, %v5367_v2  ;;  %v3923_v12 = vsel %vm1960_vm11, 1.0, %v6597_v57  ;;  %v5922_v17 = vsub.f32 %v2310_v62, %v5875_v34  ;;  %4400 = vmatpush3.msra.mxu1 %v4880_v11  ;;  %4338 = vmatprep.mubr.f32.mxu1 %v2439_v35  ;;  %v6683_v11 = vld [vmem:[#allocation5_spill] sm:$0xff]  ;;  %v6689_v35 = vld [vmem:[#allocation22_spill] sm:$0xff] }
 0x68f   : > { %v3924_v31 = vsel %vm6679_vm3, 1.0, %v6597_v57  ;;  %v2449_v8 = vand.u32 4294901760, %v2448_v9  ;;  %v2457_v0 = vand.u32 4294901760, %v5906_v24  ;;  %v2286_v20 = vsel %vm5797_vm6, %v3923_v12, %v2233_v7  ;;  %4384 = vmatprep.mubr.f32.mxu0 %v5900_v52  ;;  %4401 = vmatprep.subr.mxu1 %v6683_v11 }
 0x690   : > { %v2285_v26 = vsel %vm2089_vm13, %v3922_v22, %v2229_v55  ;;  %vm2094_vm13 = vcmp.ge.f32.partialorder %v5474_v3, %v5367_v2  ;;  %vm6680_vm9 = vcmp.eq.f32.partialorder %v5635_v15, %v5367_v2  ;;  %v2319_v23 = vsel %vm308_vm5, %v2286_v20, 0  ;;  %4402 = vmatpush3.msra.mxu1 %v6683_v11  ;;  %v6695_v20 = vld [vmem:[#allocation24_spill] sm:$0xff] }
 0x691   : > { %v2316_v51 = vsel %vm308_vm5, %v2285_v26, 0  ;;  %vm5945_vm7 = vmand %vm6680_vm9, %vm5804_vm2  ;;  %v2467_v14 = vand.u32 4294901760, %v5922_v17  ;;  %vm6684_vm8 = vcmp.ge.f32.partialorder %v5452_v36, %v5367_v2  ;;  %v2458_v7 = vsub.f32 %v5906_v24, %v2457_v0  ;;  %4339 = vmatmul.mubr.f32.gmra.mxu1 %v2449_v8 }
 0x692   : > { %v5951_v62 = vand.u32 4294901760, %v2316_v51  ;;  %v2287_v15 = vsel %vm6684_vm8, %v3924_v31, %v2237_v43  ;;  %v5965_v19 = vand.u32 4294901760, %v2319_v23  ;;  %v5969_v58 = vsub.f32 %v2313_v21, %v5900_v52  ;;  %v6693_v31 = vld [vmem:[#allocation6_spill] sm:$0xff] }
 0x693   : > { %v2322_v4 = vsel %vm308_vm5, %v2287_v15, 0  ;;  %v6686_v22 = vrot.slane %v6685_v45, %v5160_v56  ;;  %v2468_v43 = vsub.f32 %v5922_v17, %v2467_v14  ;;  %v3925_v21 = vsel %vm5945_vm7, 1.0, %v6597_v57  ;;  %4403 = vmatprep.subr.mxu1 %v6693_v31 }
 0x694   : > { %4385 = vmatmul.mubr.f32.gmra.mxu0 %v5951_v62  ;;  %v5983_v25 = vand.u32 4294901760, %v2322_v4  ;;  %v5989_v55 = vsub.f32 %v2316_v51, %v5951_v62  ;;  %v6690_v9 = vrot.slane %v6689_v35, %v5160_v56  ;;  %v2459_v12 = vand.u32 4294901760, %v2458_v7  ;;  %4404 = vmatpush3.msra.mxu1 %v6693_v31  ;;  %v6698_v7 = vld [vmem:[#allocation25_spill] sm:$0xff] }
 0x695   : > { %vm5975_vm10 = vcmp.eq.s32.totalorder %v6686_v22, 1  ;;  %4387 = vmatprep.mubr.f32.mxu0 %v5965_v19  ;;  %v2477_v8 = vand.u32 4294901760, %v5969_v58  ;;  %vm6694_vm2 = vcmp.ge.f32.partialorder %v5459_v53, %v5367_v2  ;;  %vm1737_vm11 = vcmp.eq.f32.partialorder %v5649_v29, %v5367_v2 }
 0x696   : > { %vm5994_vm6 = vcmp.eq.s32.totalorder %v6690_v9, 1  ;;  %v2288_v51 = vsel %vm6694_vm2, %v3925_v21, %v5716_v13  ;;  %vm2095_vm15 = vcmp.ge.f32.partialorder %v6695_v20, %v5367_v2  ;;  %v2469_v50 = vand.u32 4294901760, %v2468_v43  ;;  %vm1963_vm3 = vmand %vm1737_vm11, %vm5889_vm1  ;;  %v6697_v13 = vld [vmem:[#allocation2_spill] sm:$0xff]  ;;  %4341 = vmatprep.mubr.f32.mxu1 %v2459_v12  ;;  %v6699_v43 = vld [vmem:[#allocation7_spill] sm:$0xff] }
 0x697   : > { %v2325_v11 = vsel %vm308_vm5, %v2288_v51, 0  ;;  %v2487_v15 = vand.u32 4294901760, %v5989_v55  ;;  %v6696_v29 = vcombine.high %v5620_v54, %v5620_v54  ;;  %4447 = vmatprep.subr.mxu0 %v6697_v13  ;;  %vm2096_vm9 = vcmp.ge.f32.partialorder %v6698_v7, %v5367_v2  ;;  %4405 = vmatprep.subr.mxu1 %v6699_v43 }
 0x698   : > { %v2478_v45 = vsub.f32 %v5969_v58, %v2477_v8  ;;  %v6028_v22 = vand.u32 4294901760, %v2325_v11  ;;  %v3926_v33 = vsel %vm1963_vm3, 1.0, %v6597_v57  ;;  %v6033_v21 = vsub.f32 %v2319_v23, %v5965_v19  ;;  %4342 = vmatmul.mubr.f32.gmra.mxu1 %v2469_v50  ;;  %4388 = vmatmul.mubr.f32.gmra.mxu0 %v5983_v25 }
 0x699   : > { %v2245_v53 = vrot.slane %v6696_v29, %v5160_v56  ;;  %v2488_v54 = vsub.f32 %v5989_v55, %v2487_v15  ;;  %v3927_v9 = vsel %vm1964_vm4, 1.0, %v6597_v57  ;;  %v6049_v23 = vsub.f32 %v2322_v4, %v5983_v25  ;;  %4406 = vmatpush3.msra.mxu1 %v6699_v43  ;;  %4448 = vmatpush3.msra.mxu0 %v6697_v13 }
 0x69a   : > { %v2479_v12 = vand.u32 4294901760, %v2478_v45  ;;  %4390 = vmatprep.mubr.f32.mxu0 %v6028_v22  ;;  %v2497_v16 = vand.u32 4294901760, %v6033_v21  ;;  %v6700_v51 = vrot.slane %v5617_v61, %v5160_v56  ;;  %vm2097_vm14 = vcmp.ge.f32.partialorder %v6701_v47, %v5367_v2 }
 0x69b   : > { %v2289_v35 = vsel %vm2093_vm0, %v3926_v33, %v2245_v53  ;;  %v2489_v4 = vand.u32 4294901760, %v2488_v54  ;;  %v6702_v53 = vld [vmem:[#allocation8_spill] sm:$0xff]  ;;  %v2507_v45 = vand.u32 4294901760, %v6049_v23  ;;  %v6703_v33 = vrot.slane %v5626_v49, %v5160_v56  ;;  %v6704_v49 = vld [vmem:[#allocation23_spill] sm:$0xff] }
 0x69c   : > { %v2328_v31 = vsel %vm308_vm5, %v2289_v35, 0  ;;  %v2290_v63 = vsel %vm2094_vm13, %v3927_v9, %v6700_v51  ;;  %4407 = vmatprep.subr.mxu1 %v6702_v53  ;;  %4344 = vmatprep.mubr.f32.mxu1 %v2479_v12  ;;  %v2498_v3 = vsub.f32 %v6033_v21, %v2497_v16  ;;  %v2253_v54 = vrot.slane %v5638_v27, %v5160_v56  ;;  %v6713_v51 = vld [vmem:[#allocation17_spill] sm:$0xff] }
 0x69d   : > { %v6063_v50 = vand.u32 4294901760, %v2328_v31  ;;  %v2331_v29 = vsel %vm308_vm5, %v2290_v63, 0  ;;  %vm1739_vm12 = vcmp.eq.f32.partialorder %v6703_v33, %v5367_v2  ;;  %4408 = vmatpush3.msra.mxu1 %v6702_v53  ;;  %v2508_v35 = vsub.f32 %v6049_v23, %v2507_v45 }
 0x69e   : > { %v6072_v43 = vand.u32 4294901760, %v2331_v29  ;;  %4345 = vmatmul.mubr.f32.gmra.mxu1 %v2489_v4  ;;  %vm1965_vm1 = vmand %vm1739_vm12, %vm5975_vm10  ;;  %v6088_v9 = vsub.f32 %v2325_v11, %v6028_v22  ;;  %vm1740_vm0 = vcmp.eq.f32.partialorder %v5668_v28, %v5367_v2  ;;  %v6705_v12 = vrot.slane %v6704_v49, %v5160_v56  ;;  %v6709_v11 = vld [vmem:[#allocation3_spill] sm:$0xff] }
 0x69f   : > { %4391 = vmatmul.mubr.f32.gmra.mxu0 %v6063_v50  ;;  %v2499_v63 = vand.u32 4294901760, %v2498_v3  ;;  %v3928_v4 = vsel %vm1965_vm1, 1.0, %v6597_v57  ;;  %vm1966_vm7 = vmand %vm1740_vm0, %vm5994_vm6  ;;  %v6708_v36 = vcombine.high %v5617_v61, %v5617_v61  ;;  %4449 = vmatprep.subr.mxu0 %v6709_v11  ;;  %v6109_v53 = vsub.f32 %v2328_v31, %v6063_v50 }
 0x6a0   : > { %vm6095_vm13 = vcmp.eq.s32.totalorder %v6705_v12, 1  ;;  %4393 = vmatprep.mubr.f32.mxu0 %v6072_v43  ;;  %v2509_v33 = vand.u32 4294901760, %v2508_v35  ;;  %v2291_v3 = vsel %vm2095_vm15, %v3928_v4, %v2253_v54  ;;  %v2517_v49 = vand.u32 4294901760, %v6088_v9  ;;  %v6710_v12 = vld [vmem:[#allocation14_spill] sm:$0xff]  ;;  %4450 = vmatpush3.msra.mxu0 %v6709_v11 }
 0x6a1   : > { %v2257_v28 = vrot.slane %v6708_v36, %v5160_v56  ;;  %v3929_v26 = vsel %vm1966_vm7, 1.0, %v6597_v57  ;;  %4409 = vmatprep.subr.mxu1 %v6710_v12  ;;  %4347 = vmatprep.mubr.f32.mxu1 %v2499_v63  ;;  %v2334_v61 = vsel %vm308_vm5, %v2291_v3, 0  ;;  %v2527_v35 = vand.u32 4294901760, %v6109_v53 }
 0x6a2   : > { %vm1741_vm8 = vcmp.eq.f32.partialorder %v5690_v60, %v5367_v2  ;;  %4410 = vmatpush3.msra.mxu1 %v6710_v12  ;;  %v6126_v20 = vand.u32 4294901760, %v2334_v61  ;;  %v2518_v54 = vsub.f32 %v6088_v9, %v2517_v49  ;;  %v6711_v7 = vcombine.high %v5638_v27, %v5638_v27  ;;  %v6712_v60 = vld [vmem:[#allocation4_spill] sm:$0xff] }
 0x6a3   : > { %v2292_v31 = vsel %vm2096_vm9, %v3929_v26, %v2257_v28  ;;  %4348 = vmatmul.mubr.f32.gmra.mxu1 %v2509_v33  ;;  %vm1967_vm10 = vmand %vm1741_vm8, %vm6095_vm13  ;;  %4451 = vmatprep.subr.mxu0 %v6712_v60  ;;  %v2528_v28 = vsub.f32 %v6109_v53, %v2527_v35  ;;  %v6146_v3 = vsub.f32 %v2331_v29, %v6072_v43  ;;  %v6714_v26 = vld [vmem:[#allocation13_spill] sm:$0xff]  ;;  %vm3751_vm6 = vcmask 154624  }
 0x6a4   : > { %v2337_v63 = vsel %vm308_vm5, %v2292_v31, 0  ;;  %v2261_v4 = vrot.slane %v6711_v7, %v5160_v56  ;;  %v3930_v33 = vsel %vm1967_vm10, 1.0, %v6597_v57  ;;  %4452 = vmatpush3.msra.mxu0 %v6712_v60  ;;  %4411 = vmatprep.subr.mxu1 %v6713_v51  ;;  %v2519_v56 = vand.u32 4294901760, %v2518_v54 }
 0x6a5   : > { %v6139_v36 = vand.u32 4294901760, %v2337_v63  ;;  %4394 = vmatmul.mubr.f32.gmra.mxu0 %v6126_v20  ;;  %4453 = vmatprep.subr.mxu0 %v6714_v26  ;;  %v6156_v12 = vsub.f32 %v2334_v61, %v6126_v20  ;;  %v2529_v57 = vand.u32 4294901760, %v2528_v28  ;;  %v2537_v31 = vand.u32 4294901760, %v6146_v3 }
 0x6a6   : > { %v2293_v27 = vsel %vm2097_vm14, %v3930_v33, %v2261_v4  ;;  %4454 = vmatpush3.msra.mxu0 %v6714_v26  ;;  %4350 = vmatprep.mubr.f32.mxu1 %v2519_v56  ;;  %v6715_v4 = vld [vmem:[#allocation18_spill] sm:$0xff]  ;;  %v6716_v56 = vld [vmem:[#allocation9_spill] sm:$0xff] }
 0x6a7   : > { %4396 = vmatprep.mubr.f32.mxu0 %v6139_v36  ;;  %v2340_v29 = vsel %vm308_vm5, %v2293_v27, 0  ;;  %v6163_v54 = vsub.f32 %v2337_v63, %v6139_v36  ;;  %v2547_v47 = vand.u32 4294901760, %v6156_v12  ;;  %4412 = vmatpush3.msra.mxu1 %v6713_v51  ;;  %v2538_v61 = vsub.f32 %v6146_v3, %v2537_v31 }
 0x6a8   : > { %v6165_v2 = vand.u32 4294901760, %v2340_v29  ;;  %4351 = vmatmul.mubr.f32.gmra.mxu1 %v2529_v57  ;;  %4413 = vmatprep.subr.mxu1 %v6715_v4  ;;  %vm3734_vm5 = vcmask 89088  }
 0x6a9   : > { %v2557_v7 = vand.u32 4294901760, %v6163_v54  ;;  %v2548_v63 = vsub.f32 %v6156_v12, %v2547_v47  ;;  %4414 = vmatpush3.msra.mxu1 %v6715_v4  ;;  %v2539_v33 = vand.u32 4294901760, %v2538_v61  ;;  %4519 = vmatprep.subr.mxu0 %v4857_v38 }
 0x6aa   : > { %4397 = vmatmul.mubr.f32.gmra.mxu0 %v6165_v2  ;;  %v6179_v28 = vsub.f32 %v2340_v29, %v6165_v2  ;;  %4479 = vmatprep.subr.mxu1 %v6716_v56 }
 0x6ab   : > { %4455 = vmatprep.mubr.f32.mxu0 %v2417_v30  ;;  %v2558_v51 = vsub.f32 %v6163_v54, %v2557_v7  ;;  %v2549_v27 = vand.u32 4294901760, %v2548_v63  ;;  %4353 = vmatprep.mubr.f32.mxu1 %v2539_v33 }
 0x6ac   : > { %v2567_v57 = vand.u32 4294901760, %v6179_v28 }
 0x6ad   : > { %v2559_v29 = vand.u32 4294901760, %v2558_v51  ;;  %4354 = vmatmul.mubr.f32.gmra.mxu1 %v2549_v27 }
 0x6ae   : > { %4456 = vmatmul.mubr.f32.vlgmr.msra.gmra.mxu0 %v2427_v44  ;;  %v2568_v61 = vsub.f32 %v6179_v28, %v2567_v57  ;;  %v6720_v44 = vld [vmem:[#allocation15_spill] sm:$0xff] }
 0x6af   : > { %4356 = vmatprep.mubr.f32.mxu1 %v2559_v29  ;;  %4458 = vmatprep.mubr.f32.mxu0 %v2437_v59  ;;  %v6721_v59 = vld [vmem:[#allocation16_spill] sm:$0xff] }
 0x6b0   : > { %v2569_v30 = vand.u32 4294901760, %v2568_v61  ;;  %4520 = vmatpush3.msra.mxu0 %v4857_v38 }
 0x6b1   : > { %4521 = vmatprep.subr.mxu0 %v4860_v39 }
 0x6b2   : > { %4357 = vmatmul.mubr.f32.gmra.mxu1 %v2569_v30  ;;  %4459 = vmatmul.mubr.f32.gmra.mxu0 %v2447_v37  ;;  %v6723_v37 = vld [vmem:[#allocation20_spill] sm:$0xff]  ;;  %v3687_v30 = vpop.permute.xlu1 %3686 }
 0x6b3   : > { %4415 = vmatprep.mubr.f32.mxu1 %v5759_v32  ;;  %4461 = vmatprep.mubr.f32.mxu0 %v2457_v0  ;;  %v6717_v32 = vld [vmem:[#allocation10_spill] sm:$0xff] }
 0x6b4   : > { %4522 = vmatpush3.msra.mxu0 %v4860_v39 }
 0x6b5   : > { %4523 = vmatprep.subr.mxu0 %v4863_v40 }
 0x6b6   : > { %4416 = vmatmul.mubr.f32.vlgmr.msra.gmra.mxu1 %v5783_v46  ;;  %4462 = vmatmul.mubr.f32.gmra.mxu0 %v2467_v14  ;;  %v6718_v46 = vld [vmem:[#allocation11_spill] sm:$0xff] }
 0x6b7   : > { %4480 = vmatpush3.msra.mxu1 %v6716_v56  ;;  %4418 = vmatprep.mubr.f32.mxu1 %v5819_v18  ;;  %v6719_v18 = vld [vmem:[#allocation12_spill] sm:$0xff] }
 0x6b8   : > { %4464 = vmatprep.mubr.f32.mxu0 %v2477_v8  ;;  %4481 = vmatprep.subr.mxu1 %v6717_v32 }
 0x6b9   : > { %4482 = vmatpush3.msra.mxu1 %v6717_v32  ;;  %4524 = vmatpush3.msra.mxu0 %v4863_v40 }
 0x6ba   : > { %4419 = vmatmul.mubr.f32.gmra.mxu1 %v5849_v42  ;;  %4465 = vmatmul.mubr.f32.gmra.mxu0 %v2487_v15  ;;  %v6722_v42 = vld [vmem:[#allocation19_spill] sm:$0xff] }
 0x6bb   : > { %4421 = vmatprep.mubr.f32.mxu1 %v5906_v24  ;;  %4467 = vmatprep.mubr.f32.mxu0 %v2497_v16 }
 0x6bc   : > { %4483 = vmatprep.subr.mxu1 %v6718_v46  ;;  %4525 = vmatprep.subr.mxu0 %v4866_v41 }
 0x6bd   : > { %4484 = vmatpush3.msra.mxu1 %v6718_v46  ;;  %4526 = vmatpush3.msra.mxu0 %v4866_v41 }
 0x6be   : > { %4422 = vmatmul.mubr.f32.gmra.mxu1 %v5922_v17  ;;  %4468 = vmatmul.mubr.f32.gmra.mxu0 %v2507_v45 }
 0x6bf   : > { %4424 = vmatprep.mubr.f32.mxu1 %v5969_v58  ;;  %4470 = vmatprep.mubr.f32.mxu0 %v2517_v49 }
 0x6c0   : > { %4485 = vmatprep.subr.mxu1 %v6719_v18  ;;  %4527 = vmatprep.subr.mxu0 %v6697_v13 }
 0x6c1   : > { %4486 = vmatpush3.msra.mxu1 %v6719_v18  ;;  %4528 = vmatpush3.msra.mxu0 %v6697_v13 }
 0x6c2   : > { %4425 = vmatmul.mubr.f32.gmra.mxu1 %v5989_v55  ;;  %4471 = vmatmul.mubr.f32.gmra.mxu0 %v2527_v35 }
 0x6c3   : > { %4427 = vmatprep.mubr.f32.mxu1 %v6033_v21  ;;  %4473 = vmatprep.mubr.f32.mxu0 %v2537_v31 }
 0x6c4   : > { %4487 = vmatprep.subr.mxu1 %v6720_v44  ;;  %4529 = vmatprep.subr.mxu0 %v6709_v11 }
 0x6c5   : > { %4488 = vmatpush3.msra.mxu1 %v6720_v44  ;;  %4530 = vmatpush3.msra.mxu0 %v6709_v11 }
 0x6c6   : > { %4428 = vmatmul.mubr.f32.gmra.mxu1 %v6049_v23  ;;  %4474 = vmatmul.mubr.f32.gmra.mxu0 %v2547_v47 }
 0x6c7   : > { %4430 = vmatprep.mubr.f32.mxu1 %v6088_v9  ;;  %4476 = vmatprep.mubr.f32.mxu0 %v2557_v7 }
 0x6c8   : > { %4489 = vmatprep.subr.mxu1 %v6721_v59  ;;  %4531 = vmatprep.subr.mxu0 %v6712_v60 }
 0x6c9   : > { %4490 = vmatpush3.msra.mxu1 %v6721_v59  ;;  %4532 = vmatpush3.msra.mxu0 %v6712_v60 }
 0x6ca   : > { %4431 = vmatmul.mubr.f32.gmra.mxu1 %v6109_v53  ;;  %4477 = vmatmul.mubr.f32.gmra.mxu0 %v2567_v57 }
 0x6cb   : > { %4433 = vmatprep.mubr.f32.mxu1 %v6146_v3  ;;  %4535 = vmatprep.mubr.f32.mxu0 %v5594_v1 }
 0x6cc   : > { %4533 = vmatprep.subr.mxu0 %v6714_v26  ;;  %4491 = vmatprep.subr.mxu1 %v6722_v42 }
 0x6cd   : > { %4534 = vmatpush3.msra.mxu0 %v6714_v26  ;;  %4492 = vmatpush3.msra.mxu1 %v6722_v42 }
 0x6ce   : > { %4434 = vmatmul.mubr.f32.gmra.mxu1 %v6156_v12  ;;  %4536 = vmatmul.mubr.f32.vlgmr.msra.gmra.mxu0 %v5763_v6 }
 0x6cf   : > { %4436 = vmatprep.mubr.f32.mxu1 %v6163_v54  ;;  %4538 = vmatprep.mubr.f32.mxu0 %v5773_v48 }
 0x6d0   : > { %4493 = vmatprep.subr.mxu1 %v6723_v37 }
 0x6d1   : > { %4494 = vmatpush3.msra.mxu1 %v6723_v37  ;;  %v6411_v37 = vpop.permute.xlu1 %3690 }
 0x6d2   : > { %4437 = vmatmul.mubr.f32.gmra.mxu1 %v6179_v28  ;;  %4539 = vmatmul.mubr.f32.gmra.mxu0 %v5809_v5 }
 0x6d3   : > { %4495 = vmatprep.mubr.f32.mxu1 %v5594_v1  ;;  %4541 = vmatprep.mubr.f32.mxu0 %v5787_v10 }
 0x6d4   : > { %4559 = vmatprep.subr.mxu1 %v4857_v38 }
 0x6d6   : > { %4496 = vmatmul.mubr.f32.vlgmr.msra.gmra.mxu1 %v5763_v6  ;;  %4542 = vmatmul.mubr.f32.gmra.mxu0 %v5875_v34 }
 0x6d7   : > { %4567 = vmatpush3.msra.mxu1 %v4857_v38  ;;  %4498 = vmatprep.mubr.f32.mxu1 %v5773_v48 }
 0x6d8   : > { %4544 = vmatprep.mubr.f32.mxu0 %v5900_v52  ;;  %4560 = vmatprep.subr.mxu1 %v4860_v39 }
 0x6d9   : > { %4568 = vmatpush3.msra.mxu1 %v4860_v39 }
 0x6da   : > { %4499 = vmatmul.mubr.f32.gmra.mxu1 %v5809_v5  ;;  %4545 = vmatmul.mubr.f32.gmra.mxu0 %v5951_v62 }
 0x6db   : > { %4501 = vmatprep.mubr.f32.mxu1 %v5787_v10  ;;  %4547 = vmatprep.mubr.f32.mxu0 %v5965_v19 }
 0x6dc   : > { %4561 = vmatprep.subr.mxu1 %v4863_v40 }
 0x6dd   : > { %4569 = vmatpush3.msra.mxu1 %v4863_v40 }
 0x6de   : > { %4502 = vmatmul.mubr.f32.gmra.mxu1 %v5875_v34  ;;  %4548 = vmatmul.mubr.f32.gmra.mxu0 %v5983_v25 }
 0x6df   : > { %4504 = vmatprep.mubr.f32.mxu1 %v5900_v52  ;;  %4550 = vmatprep.mubr.f32.mxu0 %v6028_v22 }
 0x6e0   : > { %4562 = vmatprep.subr.mxu1 %v4866_v41 }
 0x6e1   : > { %4570 = vmatpush3.msra.mxu1 %v4866_v41 }
 0x6e2   : > { %4505 = vmatmul.mubr.f32.gmra.mxu1 %v5951_v62  ;;  %4551 = vmatmul.mubr.f32.gmra.mxu0 %v6063_v50 }
 0x6e3   : > { %4507 = vmatprep.mubr.f32.mxu1 %v5965_v19  ;;  %4563 = vmatprep.subr.mxu1 %v6697_v13 }
 0x6e4   : > { %4571 = vmatpush3.msra.mxu1 %v6697_v13 }
 0x6e5   : > { %4564 = vmatprep.subr.mxu1 %v6709_v11 }
 0x6e6   : > { %4508 = vmatmul.mubr.f32.gmra.mxu1 %v5983_v25 }
 0x6e7   : > { %4510 = vmatprep.mubr.f32.mxu1 %v6028_v22  ;;  %4572 = vmatpush3.msra.mxu1 %v6709_v11 }
 0x6e8   : > { %4565 = vmatprep.subr.mxu1 %v6712_v60 }
 0x6e9   : > { %4573 = vmatpush3.msra.mxu1 %v6712_v60 }
 0x6ea   : > { %4511 = vmatmul.mubr.f32.gmra.mxu1 %v6063_v50  ;;  %4566 = vmatprep.subr.mxu1 %v6714_v26 }
 0x6eb   : > { %4513 = vmatprep.mubr.f32.mxu1 %v6072_v43  ;;  %4574 = vmatpush3.msra.mxu1 %v6714_v26 }
 0x6ee   : > { %4514 = vmatmul.mubr.f32.gmra.mxu1 %v6126_v20 }
 0x6ef   : > { %4516 = vmatprep.mubr.f32.mxu1 %v6139_v36 }
 0x6f2   : > { %4517 = vmatmul.mubr.f32.gmra.mxu1 %v6165_v2 }
 0x6f3   : > { %4553 = vmatprep.mubr.f32.mxu1 %v6072_v43 }
 0x6f6   : > { %4554 = vmatmul.mubr.f32.vlgmr.msra.gmra.mxu1 %v6126_v20 }
 0x6f7   : > { %4556 = vmatprep.mubr.f32.mxu1 %v6139_v36 }
 0x6fa   : > { %4557 = vmatmul.mubr.f32.gmra.mxu1 %v6165_v2 }
 0x741   : > { %v6313_v38 = vpop.f32.mrf.mxu0 }
 0x743   : > { %v6315_v39 = vpop.f32.mrf.mxu0 }
 0x746   : > { %v6317_v40 = vpop.f32.mrf.mxu0 }
 0x748   : > { %v6319_v41 = vpop.f32.mrf.mxu0 }
 0x74c   : > { %v6321_v6 = vpop.f32.mrf.mxu0 }
 0x74d   : > { %v4337_v1 = vpop.f32.mrf.mxu1 }
 0x74e   : > { %v6323_v10 = vpop.f32.mrf.mxu0 }
 0x74f   : > { %v2421_v48 = vpop.f32.mrf.mxu1 }
 0x751   : > { %v6325_v5 = vpop.f32.mrf.mxu1 }
 0x753   : > { %v6329_v52 = vpop.f32.mrf.mxu1 }
 0x754   : > { %v6327_v34 = vpop.f32.mrf.mxu0 }
 0x756   : > { %v6331_v24 = vpop.f32.mrf.mxu0 }
 0x758   : > { %v6333_v17 = vpop.f32.mrf.mxu1  ;;  %v6335_v0 = vpop.f32.mrf.mxu0 }
 0x75a   : > { %v6337_v62 = vpop.f32.mrf.mxu1  ;;  %v6339_v14 = vpop.f32.mrf.mxu0 }
 0x75e   : > { %v6341_v19 = vpop.f32.mrf.mxu1 }
 0x75f   : > { %v6343_v58 = vpop.f32.mrf.mxu0 }
 0x760   : > { %v6345_v25 = vpop.f32.mrf.mxu1 }
 0x761   : > { %v6347_v55 = vpop.f32.mrf.mxu0 }
 0x763   : > { %v6349_v8 = vpop.f32.mrf.mxu1 }
 0x765   : > { %v6351_v15 = vpop.f32.mrf.mxu0  ;;  %v6353_v13 = vpop.f32.mrf.mxu1 }
 0x766   : > { %6724 = vst [vmem:[#allocation5_spill] sm:$0xff] %v6351_v15  ;;  %v3693_v15 = vpop.permute.xlu1 %3692 }
 0x767   : > { %v6355_v22 = vpop.f32.mrf.mxu0 }
 0x768   : > { %6725 = vst [vmem:[#allocation21_spill] sm:$0xff] %v6355_v22  ;;  %v6357_v21 = vpop.f32.mrf.mxu1  ;;  %v2701_v22 = vadd.f32 %v6317_v40, %v6325_v5  ;;  %v2707_v40 = vadd.f32 %v6323_v10, %v6337_v62 }
 0x76a   : > { %v6359_v23 = vpop.f32.mrf.mxu0  ;;  %v6361_v16 = vpop.f32.mrf.mxu1 }
 0x76b   : > { %6726 = vst [vmem:[#allocation22_spill] sm:$0xff] %v6359_v23 }
 0x76c   : > { %v6363_v50 = vpop.f32.mrf.mxu0 }
 0x76d   : > { %6727 = vst [vmem:[#allocation6_spill] sm:$0xff] %v6363_v50  ;;  %v6365_v45 = vpop.f32.mrf.mxu1 }
 0x76e   : > { %6728 = vst [vmem:[#allocation24_spill] sm:$0xff] %v6365_v45  ;;  %v4457_v43 = vpop.f32.mrf.mxu0 }
 0x76f   : > { %v6367_v9 = vpop.f32.mrf.mxu1 }
 0x770   : > { %6729 = vst [vmem:[#allocation2_spill] sm:$0xff] %v6367_v9  ;;  %v3046_v11 = vpop.f32.mrf.mxu0 }
 0x772   : > { %v6369_v53 = vpop.f32.mrf.mxu1  ;;  %v4460_v49 = vpop.f32.mrf.mxu0 }
 0x773   : > { %6730 = vst [vmem:[#allocation25_spill] sm:$0xff] %v6369_v53 }
 0x774   : > { %v6371_v35 = vpop.f32.mrf.mxu1  ;;  %v6373_v20 = vpop.f32.mrf.mxu0 }
 0x775   : > { %6731 = vst [vmem:[#allocation7_spill] sm:$0xff] %v6371_v35 }
 0x776   : > { %v4417_v60 = vpop.f32.mrf.mxu1  ;;  %v6375_v36 = vpop.f32.mrf.mxu0 }
 0x778   : > { %v2860_v3 = vpop.f32.mrf.mxu1  ;;  %v6377_v26 = vpop.f32.mrf.mxu0 }
 0x77a   : > { %v4420_v12 = vpop.f32.mrf.mxu1  ;;  %v6379_v31 = vpop.f32.mrf.mxu0 }
 0x77c   : > { %v2874_v54 = vpop.f32.mrf.mxu1  ;;  %v6381_v2 = vpop.f32.mrf.mxu0 }
 0x77e   : > { %v4423_v47 = vpop.f32.mrf.mxu1  ;;  %v6383_v7 = vpop.f32.mrf.mxu0 }
 0x780   : > { %v2888_v4 = vpop.f32.mrf.mxu1  ;;  %v6385_v63 = vpop.f32.mrf.mxu0 }
 0x782   : > { %v4426_v28 = vpop.f32.mrf.mxu1  ;;  %v6387_v33 = vpop.f32.mrf.mxu0 }
 0x784   : > { %v6389_v51 = vpop.f32.mrf.mxu1  ;;  %v6391_v56 = vpop.f32.mrf.mxu0 }
 0x785   : > { %6732 = vst [vmem:[#allocation26_spill] sm:$0xff] %v6391_v56 }
 0x786   : > { %v6393_v27 = vpop.f32.mrf.mxu1  ;;  %v6395_v57 = vpop.f32.mrf.mxu0 }
 0x787   : > { %6733 = vst [vmem:[#allocation8_spill] sm:$0xff] %v6395_v57  ;;  %v2689_v57 = vadd.f32 %v6313_v38, %v4337_v1  ;;  %v2695_v38 = vadd.f32 %v6319_v41, %v6329_v52  ;;  %v2882_v1 = vadd.f32 %v4420_v12, %v2701_v22 }
 0x788   : > { %v6397_v29 = vpop.f32.mrf.mxu1  ;;  %v6399_v61 = vpop.f32.mrf.mxu0 }
 0x789   : > { %6734 = vst [vmem:[#allocation23_spill] sm:$0xff] %v6399_v61  ;;  %v2683_v61 = vadd.f32 %v6315_v39, %v2421_v48  ;;  %v2868_v23 = vadd.f32 %v4417_v60, %v2689_v57  ;;  %v2713_v39 = vadd.f32 %v6321_v6, %v6333_v17  ;;  %v3689_v57 = vpop.permute.xlu0 %3688  ;;  %v3071_v22 = vadd.f32 %v4460_v49, %v2882_v1 }
 0x78a   : > { %v6401_v32 = vpop.f32.mrf.mxu1  ;;  %v6403_v46 = vpop.f32.mrf.mxu0  ;;  %v2725_v6 = vadd.f32 %v6327_v34, %v6341_v19  ;;  %v2889_v17 = vadd.f32 %v2888_v4, %v2707_v40 }
 0x78b   : > { %6735 = vst [vmem:[#allocation3_spill] sm:$0xff] %v6403_v46  ;;  %v2896_v5 = vadd.f32 %v4423_v47, %v2713_v39 }
 0x78c   : > { %v6405_v18 = vpop.f32.mrf.mxu1  ;;  %v6407_v44 = vpop.f32.mrf.mxu0  ;;  %v2910_v19 = vadd.f32 %v4426_v28, %v2725_v6 }
 0x78d   : > { %6736 = vst [vmem:[#allocation14_spill] sm:$0xff] %v6407_v44  ;;  %v2861_v44 = vadd.f32 %v2860_v3, %v2683_v61  ;;  %v3695_v34 = vpop.permute.xlu0 %3694 }
 0x78e   : > { %v6409_v59 = vpop.f32.mrf.mxu1  ;;  %v4537_v42 = vpop.f32.mrf.mxu0 }
 0x78f   : > { %6737 = vst [vmem:[#allocation4_spill] sm:$0xff] %v6409_v59  ;;  %v3047_v56 = vadd.f32 %v3046_v11, %v2861_v44 }
 0x790   : > { %v6414_v50 = vpop.f32.mrf.mxu1  ;;  %v3430_v35 = vpop.f32.mrf.mxu0 }
 0x791   : > { %6738 = vst [vmem:[#allocation17_spill] sm:$0xff] %v6414_v50  ;;  %v3055_v50 = vadd.f32 %v4457_v43, %v2868_v23 }
 0x792   : > { %v6417_v53 = vpop.f32.mrf.mxu1  ;;  %v4540_v46 = vpop.f32.mrf.mxu0 }
 0x793   : > { %6739 = vst [vmem:[#allocation13_spill] sm:$0xff] %v6417_v53  ;;  %v2875_v53 = vadd.f32 %v2874_v54, %v2695_v38  ;;  %v3087_v54 = vadd.f32 %v6375_v36, %v2896_v5 }
 0x794   : > { %v6421_v9 = vpop.f32.mrf.mxu1  ;;  %v3442_v59 = vpop.f32.mrf.mxu0 }
 0x795   : > { %v3063_v12 = vadd.f32 %v6373_v20, %v2875_v53 }
 0x796   : > { %v4497_v48 = vpop.f32.mrf.mxu1  ;;  %v4543_v60 = vpop.f32.mrf.mxu0 }
 0x797   : > { %v3268_v45 = vadd.f32 %v4497_v48, %v3055_v50  ;;  %v3697_v50 = vpop.permute.xlu1 %3696 }
 0x798   : > { %v3261_v3 = vpop.f32.mrf.mxu1  ;;  %v3454_v61 = vpop.f32.mrf.mxu0 }
 0x799   : > { %v3437_v41 = vadd.f32 %v4537_v42, %v3268_v45  ;;  %v3262_v52 = vadd.f32 %v3261_v3, %v3047_v56  ;;  %v2719_v45 = vadd.f32 %v6331_v24, %v6345_v25  ;;  %v3079_v24 = vadd.f32 %v6377_v26, %v2889_v17 }
 0x79a   : > { %v4500_v23 = vpop.f32.mrf.mxu1  ;;  %v4546_v43 = vpop.f32.mrf.mxu0 }
 0x79b   : > { %v3736_v11 = vsel %vm3734_vm5, %v3437_v41, %v3689_v57  ;;  %v3431_v10 = vadd.f32 %v3430_v35, %v3262_v52  ;;  %v3280_v62 = vadd.f32 %v4500_v23, %v3071_v22  ;;  %v2737_v35 = vadd.f32 %v6335_v0, %v6349_v8  ;;  %v3701_v8 = vpop.permute.xlu1 %3700 }
 0x79c   : > { %3753 = vst.msk [vmem:[%s4791_s24 + $0x8] sm:$0xff] %vm3751_vm6, %v3736_v11  ;;  %v3273_v49 = vpop.f32.mrf.mxu1  ;;  %v3466_v53 = vpop.f32.mrf.mxu0  ;;  %v2903_v25 = vadd.f32 %v6389_v51, %v2719_v45  ;;  %v3103_v51 = vadd.f32 %v6379_v31, %v2910_v19  ;;  %v2743_v31 = vadd.f32 %v6347_v55, %v6361_v16 }
 0x79d   : > { %v3735_v47 = vsel %vm3734_vm5, %v3431_v10, %v3687_v30  ;;  %v3449_v4 = vadd.f32 %v4540_v46, %v3280_v62  ;;  %v3274_v56 = vadd.f32 %v3273_v49, %v3063_v12  ;;  %v2731_v30 = vadd.f32 %v6339_v14, %v6353_v13  ;;  %v6740_v10 = vld [vmem:[#allocation26_spill] sm:$0xff]  ;;  %v6741_v49 = vld [vmem:[#allocation24_spill] sm:$0xff] }
 0x79e   : > { %3752 = vst.msk [vmem:[%s4791_s24] sm:$0xff] %vm3751_vm6, %v3735_v47  ;;  %v4503_v20 = vpop.f32.mrf.mxu1  ;;  %v2924_v46 = vadd.f32 %v6393_v27, %v2737_v35  ;;  %v4549_v14 = vpop.f32.mrf.mxu0  ;;  %v2931_v16 = vadd.f32 %v6405_v18, %v2743_v31  ;;  %v6743_v35 = vld [vmem:[#allocation2_spill] sm:$0xff] }
 0x79f   : > { %v3738_v36 = vsel %vm3734_vm5, %v3449_v4, %v3693_v15  ;;  %v3443_v44 = vadd.f32 %v3442_v59, %v3274_v56  ;;  %v3292_v28 = vadd.f32 %v4503_v20, %v3087_v54  ;;  %v2749_v15 = vadd.f32 %v6343_v58, %v6357_v21  ;;  %v3699_v27 = vpop.permute.xlu0 %3698  ;;  %v3705_v55 = vpop.permute.xlu1 %3704  ;;  %v6742_v54 = vld [vmem:[#allocation5_spill] sm:$0xff] }
 0x7a0   : > { %3755 = vst.msk [vmem:[%s4791_s24 + $0x18] sm:$0xff] %vm3751_vm6, %v3738_v36  ;;  %v3285_v0 = vpop.f32.mrf.mxu1  ;;  %v2917_v59 = vadd.f32 %v6397_v29, %v2731_v30  ;;  %v3119_v21 = vadd.f32 %v6383_v7, %v2924_v46  ;;  %v3478_v5 = vpop.f32.mrf.mxu0  ;;  %v3127_v62 = vadd.f32 %v6740_v10, %v2931_v16  ;;  %v6746_v46 = vld [vmem:[#allocation25_spill] sm:$0xff] }
 0x7a1   : > { %v3737_v26 = vsel %vm3734_vm5, %v3443_v44, %v6411_v37  ;;  %v3461_v42 = vadd.f32 %v4543_v60, %v3292_v28  ;;  %v3286_v38 = vadd.f32 %v3285_v0, %v3079_v24  ;;  %v3095_v37 = vadd.f32 %v6381_v2, %v2903_v25  ;;  %v6745_v24 = vld [vmem:[#allocation4_spill] sm:$0xff]  ;;  %v6747_v0 = vld [vmem:[#allocation22_spill] sm:$0xff] }
 0x7a2   : > { %3754 = vst.msk [vmem:[%s4791_s24 + $0x10] sm:$0xff] %vm3751_vm6, %v3737_v26  ;;  %v4506_v13 = vpop.f32.mrf.mxu1  ;;  %v2938_v29 = vadd.f32 %v6401_v32, %v2749_v15  ;;  %v3111_v3 = vadd.f32 %v6385_v63, %v2917_v59  ;;  %v4552_v63 = vpop.f32.mrf.mxu0  ;;  %v6748_v26 = vld [vmem:[#allocation17_spill] sm:$0xff]  ;;  %v6749_v15 = vld [vmem:[#allocation7_spill] sm:$0xff]  ;;  %v6750_v59 = vld [vmem:[#allocation6_spill] sm:$0xff] }
 0x7a3   : > { %v3740_v1 = vsel %vm3734_vm5, %v3461_v42, %v3697_v50  ;;  %v3455_v39 = vadd.f32 %v3454_v61, %v3286_v38  ;;  %v3304_v48 = vadd.f32 %v4506_v13, %v3103_v51  ;;  %v3703_v52 = vpop.permute.xlu0 %3702  ;;  %v3709_v45 = vpop.permute.xlu1 %3708  ;;  %v6751_v13 = vld [vmem:[#allocation13_spill] sm:$0xff] }
 0x7a4   : > { %3757 = vst.msk [vmem:[%s4791_s24 + $0x28] sm:$0xff] %vm3751_vm6, %v3740_v1  ;;  %v3297_v58 = vpop.f32.mrf.mxu1  ;;  %v3135_v23 = vadd.f32 %v6387_v33, %v2938_v29  ;;  %v3490_v4 = vpop.f32.mrf.mxu0  ;;  %v6752_v1 = vld [vmem:[#allocation8_spill] sm:$0xff] }
 0x7a5   : > { %v3739_v60 = vsel %vm3734_vm5, %v3455_v39, %v3695_v34  ;;  %v3473_v57 = vadd.f32 %v4546_v43, %v3304_v48  ;;  %v3298_v40 = vadd.f32 %v3297_v58, %v3095_v37  ;;  %v2761_v34 = vadd.f32 %v6742_v54, %v6741_v49  ;;  %v6753_v58 = vld [vmem:[#allocation23_spill] sm:$0xff] }
 0x7a6   : > { %3756 = vst.msk [vmem:[%s4791_s24 + $0x20] sm:$0xff] %vm3751_vm6, %v3739_v60  ;;  %v4509_v2 = vpop.f32.mrf.mxu1 }
 0x7a7   : > { %v3742_v61 = vsel %vm3734_vm5, %v3473_v57, %v3701_v8  ;;  %v3467_v41 = vadd.f32 %v3466_v53, %v3298_v40  ;;  %v3316_v7 = vadd.f32 %v4509_v2, %v3119_v21  ;;  %v6744_v53 = vld [vmem:[#allocation21_spill] sm:$0xff]  ;;  %v2952_v25 = vadd.f32 %v6745_v24, %v2761_v34  ;;  %v3707_v28 = vpop.permute.xlu0 %3706  ;;  %v3713_v29 = vpop.permute.xlu1 %3712  ;;  %v6754_v40 = vld [vmem:[#allocation3_spill] sm:$0xff] }
 0x7a8   : > { %3759 = vst.msk [vmem:[%s4791_s24 + $0x38] sm:$0xff] %vm3751_vm6, %v3742_v61  ;;  %v3309_v32 = vpop.f32.mrf.mxu1  ;;  %v2755_v20 = vadd.f32 %v6744_v53, %v6743_v35  ;;  %v2773_v8 = vadd.f32 %v6747_v0, %v6746_v46  ;;  %v6755_v61 = vld [vmem:[#allocation14_spill] sm:$0xff] }
 0x7a9   : > { %v3741_v22 = vsel %vm3734_vm5, %v3467_v41, %v3699_v27  ;;  %v3485_v6 = vadd.f32 %v4549_v14, %v3316_v7  ;;  %v3310_v17 = vadd.f32 %v3309_v32, %v3111_v3  ;;  %v2767_v14 = vadd.f32 %v6750_v59, %v6749_v15 }
 0x7aa   : > { %3758 = vst.msk [vmem:[%s4791_s24 + $0x30] sm:$0xff] %vm3751_vm6, %v3741_v22  ;;  %v4512_v18 = vpop.f32.mrf.mxu1  ;;  %v2945_v42 = vadd.f32 %v6748_v26, %v2755_v20  ;;  %v2966_v27 = vadd.f32 %v6751_v13, %v2773_v8  ;;  %v3151_v39 = vadd.f32 %v6752_v1, %v2952_v25 }
 0x7ab   : > { %v3744_v43 = vsel %vm3734_vm5, %v3485_v6, %v3705_v55  ;;  %v3479_v50 = vadd.f32 %v3478_v5, %v3310_v17  ;;  %v3328_v11 = vadd.f32 %v4512_v18, %v3135_v23  ;;  %v2959_v37 = vadd.f32 %v6421_v9, %v2767_v14  ;;  %v3711_v3 = vpop.permute.xlu0 %3710  ;;  %v3717_v17 = vpop.permute.xlu1 %3716 }
 0x7ac   : > { %3761 = vst.msk [vmem:[%s4791_s24 + $0x48] sm:$0xff] %vm3751_vm6, %v3744_v43  ;;  %v3321_v12 = vpop.f32.mrf.mxu1  ;;  %v3143_v21 = vadd.f32 %v6753_v58, %v2945_v42  ;;  %v3167_v5 = vadd.f32 %v6754_v40, %v2966_v27 }
 0x7ad   : > { %v3743_v33 = vsel %vm3734_vm5, %v3479_v50, %v3703_v52  ;;  %v3497_v19 = vadd.f32 %v4552_v63, %v3328_v11  ;;  %v3322_v47 = vadd.f32 %v3321_v12, %v3127_v62  ;;  %v3159_v41 = vadd.f32 %v6755_v61, %v2959_v37 }
 0x7ae   : > { %3760 = vst.msk [vmem:[%s4791_s24 + $0x40] sm:$0xff] %vm3751_vm6, %v3743_v33  ;;  %v4515_v56 = vpop.f32.mrf.mxu1 }
 0x7af   : > { %v3746_v36 = vsel %vm3734_vm5, %v3497_v19, %v3709_v45  ;;  %v3491_v44 = vadd.f32 %v3490_v4, %v3322_v47  ;;  %v3340_v31 = vadd.f32 %v4515_v56, %v3151_v39  ;;  %v3715_v43 = vpop.permute.xlu0 %3714 }
 0x7b0   : > { %3763 = vst.msk [vmem:[%s4791_s24 + $0x58] sm:$0xff] %vm3751_vm6, %v3746_v36  ;;  %v3333_v30 = vpop.f32.mrf.mxu1 }
 0x7b1   : > { %v3745_v38 = vsel %vm3734_vm5, %v3491_v44, %v3707_v28  ;;  %v3334_v57 = vadd.f32 %v3333_v30, %v3143_v21 }
 0x7b2   : > { %3762 = vst.msk [vmem:[%s4791_s24 + $0x50] sm:$0xff] %vm3751_vm6, %v3745_v38  ;;  %v4518_v51 = vpop.f32.mrf.mxu1 }
 0x7b3   : > { %v3352_v16 = vadd.f32 %v4518_v51, %v3167_v5 }
 0x7b4   : > { %v3345_v48 = vpop.f32.mrf.mxu1 }
 0x7b5   : > { %v3346_v52 = vadd.f32 %v3345_v48, %v3159_v41 }
 0x7b6   : > { %v4555_v60 = vpop.f32.mrf.mxu1 }
 0x7b7   : > { %v3509_v2 = vadd.f32 %v4555_v60, %v3340_v31 }
 0x7b8   : > { %v3502_v55 = vpop.f32.mrf.mxu1 }
 0x7b9   : > { %v3748_v7 = vsel %vm3734_vm5, %v3509_v2, %v3713_v29  ;;  %v3503_v9 = vadd.f32 %v3502_v55, %v3334_v57 }
 0x7ba   : > { %3765 = vst.msk [vmem:[%s4791_s24 + $0x68] sm:$0xff] %vm3751_vm6, %v3748_v7  ;;  %v4558_v32 = vpop.f32.mrf.mxu1 }
 0x7bb   : > { %v3747_v22 = vsel %vm3734_vm5, %v3503_v9, %v3711_v3  ;;  %v3521_v6 = vadd.f32 %v4558_v32, %v3352_v16 }
 0x7bc   : > { %3764 = vst.msk [vmem:[%s4791_s24 + $0x60] sm:$0xff] %vm3751_vm6, %v3747_v22  ;;  %v3514_v23 = vpop.f32.mrf.mxu1 }
 0x7bd   : > { %v3750_v63 = vsel %vm3734_vm5, %v3521_v6, %v3717_v17  ;;  %v3515_v18 = vadd.f32 %v3514_v23, %v3346_v52 }
 0x7be   : > { %3767 = vst.msk [vmem:[%s4791_s24 + $0x78] sm:$0xff] %vm3751_vm6, %v3750_v63 }
 0x7bf   : > { %v3749_v50 = vsel %vm3734_vm5, %v3515_v18, %v3715_v43 }
 0x7c0   : > { %3766 = vst.msk [vmem:[%s4791_s24 + $0x70] sm:$0xff] %vm3751_vm6, %v3749_v50 }
 0x7c1 PF: > { %s15_s15 = sadd.s32 1, %s4662_s15  }
 0x7c2   : > { %p12_p5 = scmp.ge.s32.totalorder %s15_s15, 4  }
 0x7c4   :  { %14 = sbr.rel (!%p12_p5) target bundleno = 1 (0x1), region = 95 }

</bundles_post_ra>
